<compile_context>
chip_gen: v7x
topology: tpu7x:2x2x1
jax: 0.10.0
libtpu: 0.0.40
codegen_flags: <defaults>
</compile_context>

<pallas_src>
import functools

import jax
import jax.numpy as jnp
from jax.experimental import pallas as pl
from jax.experimental.pallas import tpu as pltpu

LEAK = 0.2         # LeakyReLU negative slope
BN_EPS = 1e-5      # PyTorch BatchNorm2d default eps
TM_TARGET = 4096   # pixels per tile; sized with headroom for v7x's 64 MiB VMEM


def _choose_tile(p):
    """Pixel-tile size TM (multiple of 128) and padded pixel count."""
    if p >= TM_TARGET:
        tm = TM_TARGET
    else:
        tm = max(128, ((p + 127) // 128) * 128)
    p_pad = ((p + tm - 1) // tm) * tm
    return tm, p_pad


def _leaky(h):
    # max(x, 0.2*x) == LeakyReLU(0.2) for 0 < slope < 1 (2 VPU ops instead of 3).
    return jnp.maximum(h, LEAK * h)


def _features(x_ref, w1_ref, b1_ref, w2_ref):
    """conv1(1x1, bias) + LeakyReLU(0.2) + conv2(1x1, no bias); channels on sublanes."""
    x = x_ref[...].astype(jnp.float32)                                   # (C_in, TM)
    h1 = jnp.dot(w1_ref[...], x, preferred_element_type=jnp.float32) + b1_ref[...]
    h1 = _leaky(h1)                                                      # (ndf, TM)
    return jnp.dot(w2_ref[...], h1, preferred_element_type=jnp.float32)  # (2*ndf, TM)


def _stats_kernel(x_ref, w1_ref, b1_ref, w2_ref, gamma_ref, beta_ref,
                  s_ref, t_ref, sum_ref, sq_ref, *, tile_p, total_p, masked):
    """Pass 1: accumulate global per-channel sum / sumsq of h2; finalize BN affine."""
    i = pl.program_id(0)

    @pl.when(i == 0)
    def _():
        sum_ref[...] = jnp.zeros_like(sum_ref)
        sq_ref[...] = jnp.zeros_like(sq_ref)

    h2 = _features(x_ref, w1_ref, b1_ref, w2_ref)                        # (2*ndf, TM)

    if masked:  # zero padded pixels so they don't bias the batch statistics
        lane = jax.lax.broadcasted_iota(jnp.int32, (1, tile_p), 1)
        valid = ((i * tile_p + lane) < total_p).astype(jnp.float32)      # (1, TM)
        h2 = h2 * valid

    sum_ref[...] += jnp.sum(h2, axis=1, keepdims=True)                   # (2*ndf, 1)
    sq_ref[...] += jnp.sum(h2 * h2, axis=1, keepdims=True)

    @pl.when(i == pl.num_programs(0) - 1)
    def _():
        inv_n = 1.0 / total_p
        mu = sum_ref[...] * inv_n
        var = jnp.maximum(sq_ref[...] * inv_n - mu * mu, 0.0)            # biased var
        s = gamma_ref[...] * jax.lax.rsqrt(var + BN_EPS)
        s_ref[...] = s
        t_ref[...] = beta_ref[...] - mu * s


def _apply_kernel(x_ref, w1_ref, b1_ref, w2_ref, w3_ref, s_ref, t_ref, o_ref):
    """Pass 2: conv1 + LReLU, BN-folded conv2 + shift, LReLU, MXU 1x1 -> 1 projection."""
    x = x_ref[...].astype(jnp.float32)                                   # (C_in, TM)
    h1 = jnp.dot(w1_ref[...], x, preferred_element_type=jnp.float32) + b1_ref[...]
    h1 = _leaky(h1)                                                      # (ndf, TM)
    # Fold the BN scale into conv2's weight: a (2*ndf, ndf) multiply per tile instead
    # of a (2*ndf, TM) one.  The shift t is applied as conv2's "bias".
    w2s = w2_ref[...] * s_ref[...]                                       # (2*ndf, ndf)
    h2 = jnp.dot(w2s, h1, preferred_element_type=jnp.float32) + t_ref[...]
    h2 = _leaky(h2)                                                      # (2*ndf, TM)
    # conv3 (2*ndf -> 1) on the MXU: (1, 2*ndf) @ (2*ndf, TM) -> lane-dense (1, TM).
    out = jnp.dot(w3_ref[...], h2, preferred_element_type=jnp.float32)
    o_ref[...] = out.astype(o_ref.dtype)


def init_params(key, input_nc, ndf):
    """Deterministic init; shapes match the PyTorch module (Conv2d weight = (out, in))."""
    k1, k2, k3, k4 = jax.random.split(key, 4)
    w1 = jax.random.normal(k1, (ndf, input_nc), jnp.float32) * 0.02       # conv1 weight
    b1 = jax.random.normal(k2, (ndf, 1), jnp.float32) * 0.02              # conv1 bias
    w2 = jax.random.normal(k3, (2 * ndf, ndf), jnp.float32) * 0.02        # conv2 (no bias)
    gamma = jnp.ones((2 * ndf, 1), jnp.float32)                           # BN weight
    beta = jnp.zeros((2 * ndf, 1), jnp.float32)                           # BN bias
    w3 = jax.random.normal(k4, (1, 2 * ndf), jnp.float32) * 0.02          # conv3 (no bias)
    return (w1, b1, w2, gamma, beta, w3)


def pixel_discriminator(x_nchw, params):
    w1, b1, w2, gamma, beta, w3 = params
    n, c_in, h, w = x_nchw.shape
    ndf = w1.shape[0]
    c2 = 2 * ndf
    p = n * h * w

    tm, p_pad = _choose_tile(p)
    num_tiles = p_pad // tm

    # NCHW -> (C, P): channels on sublanes, pixels on lanes (pixel order = (n, h, w)).
    x_cp = jnp.transpose(x_nchw, (1, 0, 2, 3)).reshape(c_in, p).astype(jnp.float32)
    if p_pad != p:
        x_cp = jnp.pad(x_cp, ((0, 0), (0, p_pad - p)))

    x_spec = pl.BlockSpec((c_in, tm), lambda i: (0, i))
    full = lambda a: pl.BlockSpec(a.shape, lambda i: (0, 0))   # resident, DMA'd once
    col_spec = pl.BlockSpec((c2, 1), lambda i: (0, 0))

    # ---- pass 1: global BatchNorm statistics -> folded scale / shift ----
    stats_kernel = functools.partial(
        _stats_kernel, tile_p=tm, total_p=p, masked=(p_pad != p))
    flops1 = 2 * p_pad * (c_in * ndf + ndf * c2) + 8 * p_pad * c2
    s_vec, t_vec = pl.pallas_call(
        stats_kernel,
        out_shape=(jax.ShapeDtypeStruct((c2, 1), jnp.float32),
                   jax.ShapeDtypeStruct((c2, 1), jnp.float32)),
        grid_spec=pltpu.PrefetchScalarGridSpec(
            num_scalar_prefetch=0,
            grid=(num_tiles,),
            in_specs=[x_spec, full(w1), full(b1), full(w2), full(gamma), full(beta)],
            out_specs=[col_spec, col_spec],
            scratch_shapes=[pltpu.VMEM((c2, 1), jnp.float32),
                            pltpu.VMEM((c2, 1), jnp.float32)]),
        compiler_params=pltpu.CompilerParams(
            dimension_semantics=("arbitrary",),
            vmem_limit_bytes=32 * 1024 * 1024),
        cost_estimate=pl.CostEstimate(
            flops=flops1, transcendentals=0,
            bytes_accessed=4 * (c_in * p_pad + ndf * (c_in + 1) + c2 * (ndf + 4))),
    )(x_cp, w1, b1, w2, gamma, beta)

    # ---- pass 2: recompute features, apply BN + LeakyReLU + final projection ----
    flops2 = 2 * p_pad * (c_in * ndf + ndf * c2 + c2) + 6 * p_pad * c2
    y = pl.pallas_call(
        _apply_kernel,
        out_shape=jax.ShapeDtypeStruct((1, p_pad), jnp.float32),
        grid_spec=pltpu.PrefetchScalarGridSpec(
            num_scalar_prefetch=0,
            grid=(num_tiles,),
            in_specs=[x_spec, full(w1), full(b1), full(w2), full(w3),
                      col_spec, col_spec],
            out_specs=pl.BlockSpec((1, tm), lambda i: (0, i))),
        compiler_params=pltpu.CompilerParams(
            dimension_semantics=("parallel",),
            vmem_limit_bytes=32 * 1024 * 1024),
        cost_estimate=pl.CostEstimate(
            flops=flops2, transcendentals=0,
            bytes_accessed=4 * (c_in * p_pad + p_pad + ndf * (c_in + 1) + c2 * (ndf + 3))),
    )(x_cp, w1, b1, w2, w3, s_vec, t_vec)

    # (1, P_pad) -> drop padding -> (N, 1, H, W) to match the PyTorch output layout.
    return y[0, :p].reshape(n, h, w)[:, None, :, :]


def pixel_discriminator_ref(x, params):
    """Pure-JAX reference of the PyTorch forward (BatchNorm in training mode)."""
    w1, b1, w2, gamma, beta, w3 = params
    xf = x.astype(jnp.float32)
    hp = jax.lax.Precision.HIGHEST
    h1 = jnp.einsum('oc,nchw->nohw', w1, xf, precision=hp) + b1[:, 0][None, :, None, None]
    h1 = jnp.maximum(h1, LEAK * h1)
    h2 = jnp.einsum('oc,nchw->nohw', w2, h1, precision=hp)
    mu = jnp.mean(h2, axis=(0, 2, 3), keepdims=True)
    var = jnp.mean((h2 - mu) ** 2, axis=(0, 2, 3), keepdims=True)        # biased var
    hn = (h2 - mu) * jax.lax.rsqrt(var + BN_EPS)
    hn = hn * gamma[:, 0][None, :, None, None] + beta[:, 0][None, :, None, None]
    hn = jnp.maximum(hn, LEAK * hn)
    return jnp.einsum('oc,nchw->nohw', w3, hn, precision=hp)
    # TODO(synk): BatchNorm running_mean/running_var buffer updates (training-time side
    # effect) are not emitted; they do not affect the forward output.


if __name__ == "__main__":
    key = jax.random.PRNGKey(0)
    k_x, k_p = jax.random.split(key)

    # Small, module-consistent shapes: batch=2, input_nc=4, spatial=16, ndf=64.
    N, input_nc, H, W = 2, 4, 16, 16
    ndf = 64

    x = jax.random.normal(k_x, (N, input_nc, H, W), jnp.float32)
    params = init_params(k_p, input_nc, ndf)

    y = pixel_discriminator(x, params)
    jax.block_until_ready(y)

    assert y.shape == (N, 1, H, W), y.shape
    assert bool(jnp.all(jnp.isfinite(y)))

    y_ref = pixel_discriminator_ref(x, params)
    max_err = float(jnp.max(jnp.abs(y - y_ref)))
    assert max_err < 1e-3, f"max abs error vs reference: {max_err}"

    print("KERNEL_OK")
</pallas_src>

<mosaic_0001>
module attributes {stable_mosaic.version = 11 : i64} {
  func.func @_stats_kernel(%arg0: i32, %arg1: memref<4x512xf32, #tpu.memory_space<vmem>>, %arg2: memref<64x4xf32, #tpu.memory_space<vmem>>, %arg3: memref<64x1xf32, #tpu.memory_space<vmem>>, %arg4: memref<128x64xf32, #tpu.memory_space<vmem>>, %arg5: memref<128x1xf32, #tpu.memory_space<vmem>>, %arg6: memref<128x1xf32, #tpu.memory_space<vmem>>, %arg7: memref<128x1xf32, #tpu.memory_space<vmem>>, %arg8: memref<128x1xf32, #tpu.memory_space<vmem>>, %arg9: memref<128x1xf32, #tpu.memory_space<vmem>>, %arg10: memref<128x1xf32, #tpu.memory_space<vmem>>) attributes {dimension_semantics = [#tpu.dimension_semantics<arbitrary>], iteration_bounds = array<i64: 1>, scalar_prefetch = 0 : i64, scratch_operands = 2 : i64, tpu.core_type = #tpu.core_type<tc>, window_params = [{transform_indices = @transform_0, window_bounds = array<i64: 4, 512>}, {pipeline_mode = #tpu.pipeline_mode<synchronous>, transform_indices = @transform_1, window_bounds = array<i64: 64, 4>}, {pipeline_mode = #tpu.pipeline_mode<synchronous>, transform_indices = @transform_2, window_bounds = array<i64: 64, 1>}, {pipeline_mode = #tpu.pipeline_mode<synchronous>, transform_indices = @transform_3, window_bounds = array<i64: 128, 64>}, {pipeline_mode = #tpu.pipeline_mode<synchronous>, transform_indices = @transform_4, window_bounds = array<i64: 128, 1>}, {pipeline_mode = #tpu.pipeline_mode<synchronous>, transform_indices = @transform_5, window_bounds = array<i64: 128, 1>}, {pipeline_mode = #tpu.pipeline_mode<synchronous>, transform_indices = @transform_6, window_bounds = array<i64: 128, 1>}, {pipeline_mode = #tpu.pipeline_mode<synchronous>, transform_indices = @transform_7, window_bounds = array<i64: 128, 1>}]} {
    %c0_i32 = arith.constant 0 : i32
    %0 = arith.cmpi eq, %arg0, %c0_i32 : i32
    %1 = arith.extui %0 : i1 to i32
    %c0_i32_0 = arith.constant 0 : i32
    %2 = arith.cmpi ne, %1, %c0_i32_0 : i32
    scf.if %2 {
      %cst_22 = arith.constant 0.000000e+00 : f32
      %28 = vector.broadcast %cst_22 : f32 to vector<128x1xf32>
      %c0_23 = arith.constant 0 : index
      %c0_24 = arith.constant 0 : index
      %29 = vector.load %arg9[%c0_23, %c0_24] : memref<128x1xf32, #tpu.memory_space<vmem>>, vector<128x1xf32>
      tpu.vector_store %arg9[%c0_23, %c0_24], %28 {strides = array<i32>} : memref<128x1xf32, #tpu.memory_space<vmem>>, vector<128x1xf32>,
      %cst_25 = arith.constant 0.000000e+00 : f32
      %30 = vector.broadcast %cst_25 : f32 to vector<128x1xf32>
      %c0_26 = arith.constant 0 : index
      %c0_27 = arith.constant 0 : index
      %31 = vector.load %arg10[%c0_26, %c0_27] : memref<128x1xf32, #tpu.memory_space<vmem>>, vector<128x1xf32>
      tpu.vector_store %arg10[%c0_26, %c0_27], %30 {strides = array<i32>} : memref<128x1xf32, #tpu.memory_space<vmem>>, vector<128x1xf32>,
    } else {
    }
    %c0 = arith.constant 0 : index
    %c0_1 = arith.constant 0 : index
    %3 = vector.load %arg1[%c0, %c0_1] : memref<4x512xf32, #tpu.memory_space<vmem>>, vector<4x512xf32>
    %c0_2 = arith.constant 0 : index
    %c0_3 = arith.constant 0 : index
    %4 = vector.load %arg2[%c0_2, %c0_3] : memref<64x4xf32, #tpu.memory_space<vmem>>, vector<64x4xf32>
    %cst = arith.constant dense<0.000000e+00> : vector<64x512xf32>
    %5 = tpu.matmul %4, %3, %cst {dimension_numbers = #tpu.dot_dimension_numbers<[1], [0], [0], [1], [0, 0, 1, 1], [], []>} : vector<64x4xf32>, vector<4x512xf32>, vector<64x512xf32> -> vector<64x512xf32>
    %c0_4 = arith.constant 0 : index
    %c0_5 = arith.constant 0 : index
    %6 = vector.load %arg3[%c0_4, %c0_5] : memref<64x1xf32, #tpu.memory_space<vmem>>, vector<64x1xf32>
    %7 = vector.broadcast %6 : vector<64x1xf32> to vector<64x512xf32>
    %8 = arith.addf %5, %7 : vector<64x512xf32>
    %cst_6 = arith.constant 2.000000e-01 : f32
    %9 = vector.broadcast %cst_6 : f32 to vector<64x512xf32>
    %10 = arith.mulf %9, %8 : vector<64x512xf32>
    %11 = arith.maximumf %8, %10 : vector<64x512xf32>
    %c0_7 = arith.constant 0 : index
    %c0_8 = arith.constant 0 : index
    %12 = vector.load %arg4[%c0_7, %c0_8] : memref<128x64xf32, #tpu.memory_space<vmem>>, vector<128x64xf32>
    %cst_9 = arith.constant dense<0.000000e+00> : vector<128x512xf32>
    %13 = tpu.matmul %12, %11, %cst_9 {dimension_numbers = #tpu.dot_dimension_numbers<[1], [0], [0], [1], [0, 0, 1, 1], [], []>} : vector<128x64xf32>, vector<64x512xf32>, vector<128x512xf32> -> vector<128x512xf32>
    %c0_10 = arith.constant 0 : index
    %c0_11 = arith.constant 0 : index
    %14 = vector.load %arg9[%c0_10, %c0_11] : memref<128x1xf32, #tpu.memory_space<vmem>>, vector<128x1xf32>
    %cst_12 = arith.constant dense<0.000000e+00> : vector<128xf32>
    %15 = vector.multi_reduction <add>, %13, %cst_12 [1] : vector<128x512xf32> to vector<128xf32>
    %16 = vector.shape_cast %15 : vector<128xf32> to vector<128x1xf32>
    %17 = arith.addf %14, %16 : vector<128x1xf32>
    %c0_13 = arith.constant 0 : index
    %c0_14 = arith.constant 0 : index
    %18 = vector.load %arg9[%c0_13, %c0_14] : memref<128x1xf32, #tpu.memory_space<vmem>>, vector<128x1xf32>
    tpu.vector_store %arg9[%c0_13, %c0_14], %17 {strides = array<i32>} : memref<128x1xf32, #tpu.memory_space<vmem>>, vector<128x1xf32>,
    %c0_15 = arith.constant 0 : index
    %c0_16 = arith.constant 0 : index
    %19 = vector.load %arg10[%c0_15, %c0_16] : memref<128x1xf32, #tpu.memory_space<vmem>>, vector<128x1xf32>
    %20 = arith.mulf %13, %13 : vector<128x512xf32>
    %cst_17 = arith.constant dense<0.000000e+00> : vector<128xf32>
    %21 = vector.multi_reduction <add>, %20, %cst_17 [1] : vector<128x512xf32> to vector<128xf32>
    %22 = vector.shape_cast %21 : vector<128xf32> to vector<128x1xf32>
    %23 = arith.addf %19, %22 : vector<128x1xf32>
    %c0_18 = arith.constant 0 : index
    %c0_19 = arith.constant 0 : index
    %24 = vector.load %arg10[%c0_18, %c0_19] : memref<128x1xf32, #tpu.memory_space<vmem>>, vector<128x1xf32>
    tpu.vector_store %arg10[%c0_18, %c0_19], %23 {strides = array<i32>} : memref<128x1xf32, #tpu.memory_space<vmem>>, vector<128x1xf32>,
    %c0_i32_20 = arith.constant 0 : i32
    %25 = arith.cmpi eq, %arg0, %c0_i32_20 : i32
    %26 = arith.extui %25 : i1 to i32
    %c0_i32_21 = arith.constant 0 : i32
    %27 = arith.cmpi ne, %26, %c0_i32_21 : i32
    scf.if %27 {
      %c0_22 = arith.constant 0 : index
      %c0_23 = arith.constant 0 : index
      %28 = vector.load %arg9[%c0_22, %c0_23] : memref<128x1xf32, #tpu.memory_space<vmem>>, vector<128x1xf32>
      %cst_24 = arith.constant 0.001953125 : f32
      %29 = vector.broadcast %cst_24 : f32 to vector<128x1xf32>
      %30 = arith.mulf %28, %29 : vector<128x1xf32>
      %c0_25 = arith.constant 0 : index
      %c0_26 = arith.constant 0 : index
      %31 = vector.load %arg10[%c0_25, %c0_26] : memref<128x1xf32, #tpu.memory_space<vmem>>, vector<128x1xf32>
      %cst_27 = arith.constant 0.001953125 : f32
      %32 = vector.broadcast %cst_27 : f32 to vector<128x1xf32>
      %33 = arith.mulf %31, %32 : vector<128x1xf32>
      %34 = arith.mulf %30, %30 : vector<128x1xf32>
      %35 = arith.subf %33, %34 : vector<128x1xf32>
      %cst_28 = arith.constant 0.000000e+00 : f32
      %36 = vector.broadcast %cst_28 : f32 to vector<128x1xf32>
      %37 = arith.maximumf %35, %36 : vector<128x1xf32>
      %c0_29 = arith.constant 0 : index
      %c0_30 = arith.constant 0 : index
      %38 = vector.load %arg5[%c0_29, %c0_30] : memref<128x1xf32, #tpu.memory_space<vmem>>, vector<128x1xf32>
      %cst_31 = arith.constant 9.99999974E-6 : f32
      %39 = vector.broadcast %cst_31 : f32 to vector<128x1xf32>
      %40 = arith.addf %37, %39 : vector<128x1xf32>
      %41 = math.rsqrt %40 : vector<128x1xf32>
      %42 = arith.mulf %38, %41 : vector<128x1xf32>
      %c0_32 = arith.constant 0 : index
      %c0_33 = arith.constant 0 : index
      %43 = vector.load %arg7[%c0_32, %c0_33] : memref<128x1xf32, #tpu.memory_space<vmem>>, vector<128x1xf32>
      tpu.vector_store %arg7[%c0_32, %c0_33], %42 {strides = array<i32>} : memref<128x1xf32, #tpu.memory_space<vmem>>, vector<128x1xf32>,
      %c0_34 = arith.constant 0 : index
      %c0_35 = arith.constant 0 : index
      %44 = vector.load %arg6[%c0_34, %c0_35] : memref<128x1xf32, #tpu.memory_space<vmem>>, vector<128x1xf32>
      %45 = arith.mulf %30, %42 : vector<128x1xf32>
      %46 = arith.subf %44, %45 : vector<128x1xf32>
      %c0_36 = arith.constant 0 : index
      %c0_37 = arith.constant 0 : index
      %47 = vector.load %arg8[%c0_36, %c0_37] : memref<128x1xf32, #tpu.memory_space<vmem>>, vector<128x1xf32>
      tpu.vector_store %arg8[%c0_36, %c0_37], %46 {strides = array<i32>} : memref<128x1xf32, #tpu.memory_space<vmem>>, vector<128x1xf32>,
    } else {
    }
    return
  }
  func.func @transform_0(%arg0: i32) -> (i32, i32) {
    %c0_i32 = arith.constant 0 : i32
    %c0_i32_0 = arith.constant 0 : i32
    return %c0_i32, %arg0 : i32, i32
  }
  func.func @transform_1(%arg0: i32) -> (i32, i32) {
    %c0_i32 = arith.constant 0 : i32
    %c0_i32_0 = arith.constant 0 : i32
    %c0_i32_1 = arith.constant 0 : i32
    return %c0_i32, %c0_i32_0 : i32, i32
  }
  func.func @transform_2(%arg0: i32) -> (i32, i32) {
    %c0_i32 = arith.constant 0 : i32
    %c0_i32_0 = arith.constant 0 : i32
    %c0_i32_1 = arith.constant 0 : i32
    return %c0_i32, %c0_i32_0 : i32, i32
  }
  func.func @transform_3(%arg0: i32) -> (i32, i32) {
    %c0_i32 = arith.constant 0 : i32
    %c0_i32_0 = arith.constant 0 : i32
    %c0_i32_1 = arith.constant 0 : i32
    return %c0_i32, %c0_i32_0 : i32, i32
  }
  func.func @transform_4(%arg0: i32) -> (i32, i32) {
    %c0_i32 = arith.constant 0 : i32
    %c0_i32_0 = arith.constant 0 : i32
    %c0_i32_1 = arith.constant 0 : i32
    return %c0_i32, %c0_i32_0 : i32, i32
  }
  func.func @transform_5(%arg0: i32) -> (i32, i32) {
    %c0_i32 = arith.constant 0 : i32
    %c0_i32_0 = arith.constant 0 : i32
    %c0_i32_1 = arith.constant 0 : i32
    return %c0_i32, %c0_i32_0 : i32, i32
  }
  func.func @transform_6(%arg0: i32) -> (i32, i32) {
    %c0_i32 = arith.constant 0 : i32
    %c0_i32_0 = arith.constant 0 : i32
    %c0_i32_1 = arith.constant 0 : i32
    return %c0_i32, %c0_i32_0 : i32, i32
  }
  func.func @transform_7(%arg0: i32) -> (i32, i32) {
    %c0_i32 = arith.constant 0 : i32
    %c0_i32_0 = arith.constant 0 : i32
    %c0_i32_1 = arith.constant 0 : i32
    return %c0_i32, %c0_i32_0 : i32, i32
  }
}

</mosaic_0001>

<bundles_post_ra>
// kernel: tpu_custom_call.1
= control target key start
LH: loop header
LB: loop body
LE: loop exit
PB: predicated region body
PF: predicated region fallthrough
CT: control target
= control target key end

     0   :  { %vm149_vm0 = vcmask 1043456   ;;  %v1545_v2 = vmov 0.0   ;;  %v1546_v5 = vmov 0   ;;  %vm124_vm1 = vcmask 31744   ;;  %s2184_s0 = inlined_call_operand.vmem [shape: f32[4,512], index: 0, kind: input, shape index: {}]   ;;  %s2185_s1 = inlined_call_operand.vmem [shape: f32[64,4], index: 1, kind: input, shape index: {}]   ;;  %s2186_s2 = inlined_call_operand.vmem [shape: f32[64,1], index: 2, kind: input, shape index: {}]   ;;  %s2187_s3 = inlined_call_operand.vmem [shape: f32[128,64], index: 3, kind: input, shape index: {}]   ;;  %s2188_s4 = inlined_call_operand.vmem [shape: f32[128,1], index: 4, kind: input, shape index: {}]   ;;  %s2189_s5 = inlined_call_operand.vmem [shape: f32[128,1], index: 5, kind: input, shape index: {}]   ;;  %s2190_s6 = inlined_call_operand.vmem [shape: f32[128,1], index: 6, kind: output, shape index: {0}]   ;;  %s2191_s7 = inlined_call_operand.vmem [shape: f32[128,1], index: 7, kind: output, shape index: {1}]  }
   0x1   :  { %v62_v0 = vld [vmem:[%s2184_s0] sm:$0xff]  ;;  %v63_v1 = vld [vmem:[%s2184_s0 + $0x8] sm:$0xff]  ;;  %222 = vmatprep.mubr.f32.mxu0 %v1545_v2  ;;  %335 = vmatprep.mubr.f32.mxu1 %v1545_v2  ;;  %v74_v8 = vld [vmem:[%s2186_s2 + $0x10] sm:$0xff]  ;;  %vm464_vm2 = vcmask 523264   ;;  %vm29_vm3 = vcmask 7168  }
   0x2   :  { %v122_v3 = vcombine.high %v62_v0, %v62_v0  ;;  %v123_v4 = vcombine.high %v63_v1, %v63_v1  ;;  %1509 = vset.pattern.permute.xlu0 %v1546_v5  ;;  %1510 = vset.pattern.permute.xlu1 %v1546_v5  ;;  %v64_v6 = vld [vmem:[%s2185_s1] sm:$0xff]  ;;  %v65_v9 = vld [vmem:[%s2185_s1 + $0x8] sm:$0xff]  ;;  %v75_v11 = vld [vmem:[%s2186_s2 + $0x18] sm:$0xff]  ;;  %30 = vst.msk [vmem:[#allocation2] sm:$0xff] %vm29_vm3, %v1545_v2 }
   0x3   :  { %v72_v7 = vld [vmem:[%s2186_s2] sm:$0xff]  ;;  %92 = vperm.xlu1 %1510, %v74_v8   ;;  %v73_v10 = vld [vmem:[%s2186_s2 + $0x8] sm:$0xff]  ;;  %v66_v12 = vld [vmem:[%s2185_s1 + $0x10] sm:$0xff]  ;;  %31 = vst.msk [vmem:[#allocation2 + $0x8] sm:$0xff] %vm29_vm3, %v1545_v2 }
   0x4   :  { %1423 = vmatprep.subr.msk.mxu0 %vm149_vm0, %v122_v3  ;;  %1433 = vmatprep.subr.msk.mxu1 %vm149_vm0, %v123_v4  ;;  %v76_v13 = vld [vmem:[%s2186_s2 + $0x20] sm:$0xff]  ;;  %v77_v14 = vld [vmem:[%s2186_s2 + $0x28] sm:$0xff]  ;;  %v67_v15 = vld [vmem:[%s2185_s1 + $0x18] sm:$0xff]  ;;  %32 = vst.msk [vmem:[#allocation2 + $0x10] sm:$0xff] %vm29_vm3, %v1545_v2 }
   0x5   :  { %1424 = vmatpush1.msk.msra.mxu0 %vm149_vm0, %v62_v0  ;;  %1434 = vmatpush1.msk.msra.mxu1 %vm149_vm0, %v63_v1  ;;  %v78_v16 = vld [vmem:[%s2186_s2 + $0x30] sm:$0xff]  ;;  %v79_v17 = vld [vmem:[%s2186_s2 + $0x38] sm:$0xff]  ;;  %v68_v18 = vld [vmem:[%s2185_s1 + $0x20] sm:$0xff]  ;;  %33 = vst.msk [vmem:[#allocation2 + $0x18] sm:$0xff] %vm29_vm3, %v1545_v2 }
   0x6   :  { %1425 = vmatmul.mubr.msk.f32.vlgmr.msra.gmra.mrb[0].mxu0 %vm124_vm1, %v64_v6  ;;  %1435 = vmatmul.mubr.msk.f32.vlgmr.msra.gmra.mrb[0].mxu1 %vm124_vm1, %v64_v6  ;;  %v69_v19 = vld [vmem:[%s2185_s1 + $0x28] sm:$0xff]  ;;  %v70_v20 = vld [vmem:[%s2185_s1 + $0x30] sm:$0xff]  ;;  %v71_v21 = vld [vmem:[%s2185_s1 + $0x38] sm:$0xff]  ;;  %34 = vst.msk [vmem:[#allocation2 + $0x20] sm:$0xff] %vm29_vm3, %v1545_v2 }
   0x7   :  { %228 = vmatprep.mubr.f32.mxu0 %v1545_v2  ;;  %341 = vmatprep.mubr.f32.mxu1 %v1545_v2  ;;  %35 = vst.msk [vmem:[#allocation2 + $0x28] sm:$0xff] %vm29_vm3, %v1545_v2  ;;  %36 = vst.msk [vmem:[#allocation2 + $0x30] sm:$0xff] %vm29_vm3, %v1545_v2 }
   0x8   :  { %82 = vperm.xlu0 %1509, %v72_v7   ;;  %97 = vperm.xlu1 %1510, %v75_v11   ;;  %37 = vst.msk [vmem:[#allocation2 + $0x38] sm:$0xff] %vm29_vm3, %v1545_v2  ;;  %38 = vst.msk [vmem:[#allocation2 + $0x40] sm:$0xff] %vm29_vm3, %v1545_v2 }
   0x9   :  { %39 = vst.msk [vmem:[#allocation2 + $0x48] sm:$0xff] %vm29_vm3, %v1545_v2  ;;  %40 = vst.msk [vmem:[#allocation2 + $0x50] sm:$0xff] %vm29_vm3, %v1545_v2 }
   0xa   :  { %1426 = vmatmul.mubr.msk.f32.gmra.mrb[2].mxu0 %vm124_vm1, %v65_v9  ;;  %1436 = vmatmul.mubr.msk.f32.gmra.mrb[2].mxu1 %vm124_vm1, %v65_v9  ;;  %41 = vst.msk [vmem:[#allocation2 + $0x58] sm:$0xff] %vm29_vm3, %v1545_v2  ;;  %42 = vst.msk [vmem:[#allocation2 + $0x60] sm:$0xff] %vm29_vm3, %v1545_v2 }
   0xb   :  { %234 = vmatprep.mubr.f32.mxu0 %v1545_v2  ;;  %347 = vmatprep.mubr.f32.mxu1 %v1545_v2  ;;  %43 = vst.msk [vmem:[#allocation2 + $0x68] sm:$0xff] %vm29_vm3, %v1545_v2  ;;  %44 = vst.msk [vmem:[#allocation2 + $0x70] sm:$0xff] %vm29_vm3, %v1545_v2 }
   0xc   :  { %87 = vperm.xlu0 %1509, %v73_v10   ;;  %107 = vperm.xlu1 %1510, %v77_v14   ;;  %45 = vst.msk [vmem:[#allocation2 + $0x78] sm:$0xff] %vm29_vm3, %v1545_v2  ;;  %46 = vst.msk [vmem:[#allocation3] sm:$0xff] %vm29_vm3, %v1545_v2 }
   0xd   :  { %47 = vst.msk [vmem:[#allocation3 + $0x8] sm:$0xff] %vm29_vm3, %v1545_v2  ;;  %48 = vst.msk [vmem:[#allocation3 + $0x10] sm:$0xff] %vm29_vm3, %v1545_v2 }
   0xe   :  { %1427 = vmatmul.mubr.msk.f32.gmra.mrb[4].mxu0 %vm124_vm1, %v66_v12  ;;  %1437 = vmatmul.mubr.msk.f32.gmra.mrb[4].mxu1 %vm124_vm1, %v66_v12  ;;  %49 = vst.msk [vmem:[#allocation3 + $0x18] sm:$0xff] %vm29_vm3, %v1545_v2  ;;  %50 = vst.msk [vmem:[#allocation3 + $0x20] sm:$0xff] %vm29_vm3, %v1545_v2 }
   0xf   :  { %240 = vmatprep.mubr.f32.mxu0 %v1545_v2  ;;  %353 = vmatprep.mubr.f32.mxu1 %v1545_v2  ;;  %51 = vst.msk [vmem:[#allocation3 + $0x28] sm:$0xff] %vm29_vm3, %v1545_v2  ;;  %52 = vst.msk [vmem:[#allocation3 + $0x30] sm:$0xff] %vm29_vm3, %v1545_v2 }
  0x10   :  { %102 = vperm.xlu0 %1509, %v76_v13   ;;  %117 = vperm.xlu1 %1510, %v79_v17   ;;  %53 = vst.msk [vmem:[#allocation3 + $0x38] sm:$0xff] %vm29_vm3, %v1545_v2  ;;  %54 = vst.msk [vmem:[#allocation3 + $0x40] sm:$0xff] %vm29_vm3, %v1545_v2 }
  0x11   :  { %55 = vst.msk [vmem:[#allocation3 + $0x48] sm:$0xff] %vm29_vm3, %v1545_v2  ;;  %56 = vst.msk [vmem:[#allocation3 + $0x50] sm:$0xff] %vm29_vm3, %v1545_v2 }
  0x12   :  { %1428 = vmatmul.mubr.msk.f32.gmra.mrb[6].mxu0 %vm124_vm1, %v67_v15  ;;  %1438 = vmatmul.mubr.msk.f32.gmra.mrb[6].mxu1 %vm124_vm1, %v67_v15  ;;  %57 = vst.msk [vmem:[#allocation3 + $0x58] sm:$0xff] %vm29_vm3, %v1545_v2  ;;  %58 = vst.msk [vmem:[#allocation3 + $0x60] sm:$0xff] %vm29_vm3, %v1545_v2 }
  0x13   :  { %246 = vmatprep.mubr.f32.mxu0 %v1545_v2  ;;  %359 = vmatprep.mubr.f32.mxu1 %v1545_v2  ;;  %59 = vst.msk [vmem:[#allocation3 + $0x68] sm:$0xff] %vm29_vm3, %v1545_v2  ;;  %60 = vst.msk [vmem:[#allocation3 + $0x70] sm:$0xff] %vm29_vm3, %v1545_v2 }
  0x14   :  { %112 = vperm.xlu0 %1509, %v78_v16   ;;  %61 = vst.msk [vmem:[#allocation3 + $0x78] sm:$0xff] %vm29_vm3, %v1545_v2 }
  0x16   :  { %1429 = vmatmul.mubr.msk.f32.gmra.mrb[8].mxu0 %vm124_vm1, %v68_v18  ;;  %1439 = vmatmul.mubr.msk.f32.gmra.mrb[8].mxu1 %vm124_vm1, %v68_v18 }
  0x17   :  { %252 = vmatprep.mubr.f32.mxu0 %v1545_v2  ;;  %365 = vmatprep.mubr.f32.mxu1 %v1545_v2 }
  0x1a   :  { %1430 = vmatmul.mubr.msk.f32.gmra.mrb[10].mxu0 %vm124_vm1, %v69_v19  ;;  %1440 = vmatmul.mubr.msk.f32.gmra.mrb[10].mxu1 %vm124_vm1, %v69_v19 }
  0x1b   :  { %258 = vmatprep.mubr.f32.mxu0 %v1545_v2  ;;  %371 = vmatprep.mubr.f32.mxu1 %v1545_v2 }
  0x1e   :  { %1431 = vmatmul.mubr.msk.f32.gmra.mrb[12].mxu0 %vm124_vm1, %v70_v20  ;;  %1441 = vmatmul.mubr.msk.f32.gmra.mrb[12].mxu1 %vm124_vm1, %v70_v20 }
  0x1f   :  { %264 = vmatprep.mubr.f32.mxu0 %v1545_v2  ;;  %377 = vmatprep.mubr.f32.mxu1 %v1545_v2 }
  0x22   :  { %1432 = vmatmul.mubr.msk.f32.gmra.mrb[14].mxu0 %vm124_vm1, %v71_v21  ;;  %1442 = vmatmul.mubr.msk.f32.gmra.mrb[14].mxu1 %vm124_vm1, %v71_v21 }
  0x23   :  { %577 = vmatprep.mubr.f32.mxu0 %v1545_v2  ;;  %738 = vmatprep.mubr.f32.mxu1 %v1545_v2 }
  0x82   :  { %v93_v32 = vpop.permute.xlu1 %92 }
  0x87   :  { %v83_v22 = vpop.permute.xlu0 %82  ;;  %v98_v1 = vpop.permute.xlu1 %97 }
  0x8b   :  { %v88_v29 = vpop.permute.xlu0 %87 }
  0x8f   :  { %v103_v19 = vpop.permute.xlu0 %102 }
  0xd9   :  { %v224_v23 = vpop.f32.mrb[0].mxu0  ;;  %v337_v24 = vpop.f32.mrb[0].mxu1 }
  0xda   :  { %v225_v25 = vadd.f32 %v224_v23, %v83_v22  ;;  %v338_v26 = vadd.f32 %v337_v24, %v83_v22  ;;  %v226_v27 = vpop.f32.mrb[1].mxu0  ;;  %v339_v28 = vpop.f32.mrb[1].mxu1 }
  0xdb   :  { %v227_v30 = vadd.f32 %v226_v27, %v83_v22  ;;  %v340_v31 = vadd.f32 %v339_v28, %v83_v22 }
  0xdc   :  { %v384_v33 = vmul.f32 0.2, %v225_v25  ;;  %v386_v34 = vmul.f32 0.2, %v338_v26 }
  0xdd   :  { %v385_v35 = vmul.f32 0.2, %v227_v30  ;;  %v387_v36 = vmul.f32 0.2, %v340_v31  ;;  %v230_v37 = vpop.f32.mrb[2].mxu0  ;;  %v343_v38 = vpop.f32.mrb[2].mxu1 }
  0xde   :  { %v231_v39 = vadd.f32 %v230_v37, %v88_v29  ;;  %v344_v40 = vadd.f32 %v343_v38, %v88_v29  ;;  %v232_v41 = vpop.f32.mrb[3].mxu0  ;;  %v345_v42 = vpop.f32.mrb[3].mxu1  ;;  %v416_v45 = vmax.f32 %v225_v25, %v384_v33  ;;  %v418_v46 = vmax.f32 %v338_v26, %v386_v34 }
  0xdf   :  { %v233_v43 = vadd.f32 %v232_v41, %v88_v29  ;;  %v346_v44 = vadd.f32 %v345_v42, %v88_v29  ;;  %v417_v49 = vmax.f32 %v227_v30, %v385_v35  ;;  %v419_v50 = vmax.f32 %v340_v31, %v387_v36 }
  0xe0   :  { %v388_v47 = vmul.f32 0.2, %v231_v39  ;;  %v390_v48 = vmul.f32 0.2, %v344_v40 }
  0xe1   :  { %v389_v51 = vmul.f32 0.2, %v233_v43  ;;  %v391_v52 = vmul.f32 0.2, %v346_v44  ;;  %v236_v53 = vpop.f32.mrb[4].mxu0  ;;  %v349_v54 = vpop.f32.mrb[4].mxu1 }
  0xe2   :  { %v420_v55 = vmax.f32 %v231_v39, %v388_v47  ;;  %v422_v56 = vmax.f32 %v344_v40, %v390_v48  ;;  %v237_v57 = vadd.f32 %v236_v53, %v93_v32  ;;  %v350_v58 = vadd.f32 %v349_v54, %v93_v32  ;;  %v238_v59 = vpop.f32.mrb[5].mxu0  ;;  %v351_v60 = vpop.f32.mrb[5].mxu1 }
  0xe3   :  { %v421_v61 = vmax.f32 %v233_v43, %v389_v51  ;;  %v423_v62 = vmax.f32 %v346_v44, %v391_v52  ;;  %v239_v63 = vadd.f32 %v238_v59, %v93_v32  ;;  %v352_v0 = vadd.f32 %v351_v60, %v93_v32  ;;  %v108_v40 = vpop.permute.xlu1 %107 }
  0xe4   :  { %v1477_v3 = vpack.c.bf16 %v420_v55, %v416_v45  ;;  %v1493_v4 = vpack.c.bf16 %v422_v56, %v418_v46  ;;  %v392_v5 = vmul.f32 0.2, %v237_v57  ;;  %v394_v6 = vmul.f32 0.2, %v350_v58 }
  0xe5   :  { %v393_v7 = vmul.f32 0.2, %v239_v63  ;;  %v395_v8 = vmul.f32 0.2, %v352_v0  ;;  %v242_v9 = vpop.f32.mrb[6].mxu0  ;;  %v355_v10 = vpop.f32.mrb[6].mxu1  ;;  %v1475_v11 = vpack.c.bf16 %v421_v61, %v417_v49  ;;  %v1491_v12 = vpack.c.bf16 %v423_v62, %v419_v50 }
  0xe6   :  { %v243_v13 = vadd.f32 %v242_v9, %v98_v1  ;;  %v356_v14 = vadd.f32 %v355_v10, %v98_v1  ;;  %v244_v15 = vpop.f32.mrb[7].mxu0  ;;  %v357_v16 = vpop.f32.mrb[7].mxu1  ;;  %v424_v20 = vmax.f32 %v237_v57, %v392_v5  ;;  %v426_v21 = vmax.f32 %v350_v58, %v394_v6 }
  0xe7   :  { %v245_v17 = vadd.f32 %v244_v15, %v98_v1  ;;  %v358_v18 = vadd.f32 %v357_v16, %v98_v1  ;;  %1476 = vmatprep.subr.bf16.mxu0 %v1475_v11  ;;  %1492 = vmatprep.subr.bf16.mxu1 %v1491_v12  ;;  %v425_v24 = vmax.f32 %v239_v63, %v393_v7  ;;  %v113_v57 = vpop.permute.xlu0 %112  ;;  %v118_v15 = vpop.permute.xlu1 %117 }
  0xe8   :  { %v396_v22 = vmul.f32 0.2, %v243_v13  ;;  %v398_v23 = vmul.f32 0.2, %v356_v14  ;;  %1478 = vmatpush1.bf16.msra.mxu0 %v1477_v3  ;;  %v427_v25 = vmax.f32 %v352_v0, %v395_v8  ;;  %1494 = vmatpush1.bf16.msra.mxu1 %v1493_v4 }
  0xe9   :  { %v397_v26 = vmul.f32 0.2, %v245_v17  ;;  %v399_v27 = vmul.f32 0.2, %v358_v18  ;;  %v248_v28 = vpop.f32.mrb[8].mxu0  ;;  %v361_v29 = vpop.f32.mrb[8].mxu1 }
  0xea   :  { %v428_v30 = vmax.f32 %v243_v13, %v396_v22  ;;  %v430_v31 = vmax.f32 %v356_v14, %v398_v23  ;;  %v249_v32 = vadd.f32 %v248_v28, %v103_v19  ;;  %v362_v33 = vadd.f32 %v361_v29, %v103_v19  ;;  %v250_v34 = vpop.f32.mrb[9].mxu0  ;;  %v363_v35 = vpop.f32.mrb[9].mxu1 }
  0xeb   :  { %v429_v36 = vmax.f32 %v245_v17, %v397_v26  ;;  %v431_v37 = vmax.f32 %v358_v18, %v399_v27  ;;  %v251_v38 = vadd.f32 %v250_v34, %v103_v19  ;;  %v364_v39 = vadd.f32 %v363_v35, %v103_v19 }
  0xec   :  { %v1481_v41 = vpack.c.bf16 %v428_v30, %v424_v20  ;;  %v1497_v42 = vpack.c.bf16 %v430_v31, %v426_v21  ;;  %v400_v43 = vmul.f32 0.2, %v249_v32  ;;  %v402_v44 = vmul.f32 0.2, %v362_v33 }
  0xed   :  { %v401_v45 = vmul.f32 0.2, %v251_v38  ;;  %v403_v46 = vmul.f32 0.2, %v364_v39  ;;  %v254_v47 = vpop.f32.mrb[10].mxu0  ;;  %v367_v48 = vpop.f32.mrb[10].mxu1  ;;  %v1479_v49 = vpack.c.bf16 %v429_v36, %v425_v24  ;;  %v1495_v50 = vpack.c.bf16 %v431_v37, %v427_v25 }
  0xee   :  { %v255_v51 = vadd.f32 %v254_v47, %v108_v40  ;;  %v368_v52 = vadd.f32 %v367_v48, %v108_v40  ;;  %v256_v53 = vpop.f32.mrb[11].mxu0  ;;  %v369_v54 = vpop.f32.mrb[11].mxu1  ;;  %v432_v58 = vmax.f32 %v249_v32, %v400_v43  ;;  %v434_v59 = vmax.f32 %v362_v33, %v402_v44  ;;  %v448_v48 = vld [vmem:[%s2187_s3] sm:$0xff] }
  0xef   :  { %v257_v55 = vadd.f32 %v256_v53, %v108_v40  ;;  %v370_v56 = vadd.f32 %v369_v54, %v108_v40  ;;  %1480 = vmatprep.subr.bf16.mxu0 %v1479_v49  ;;  %1496 = vmatprep.subr.bf16.mxu1 %v1495_v50  ;;  %v433_v62 = vmax.f32 %v251_v38, %v401_v45  ;;  %v449_v49 = vld [vmem:[%s2187_s3 + $0x8] sm:$0xff]  ;;  %v450_v50 = vld [vmem:[%s2187_s3 + $0x10] sm:$0xff] }
  0xf0   :  { %v404_v60 = vmul.f32 0.2, %v255_v51  ;;  %v406_v61 = vmul.f32 0.2, %v368_v52  ;;  %1482 = vmatpush1.bf16.msra.mxu0 %v1481_v41  ;;  %v435_v63 = vmax.f32 %v364_v39, %v403_v46  ;;  %1498 = vmatpush1.bf16.msra.mxu1 %v1497_v42  ;;  %v453_v53 = vld [vmem:[%s2187_s3 + $0x28] sm:$0xff]  ;;  %v454_v54 = vld [vmem:[%s2187_s3 + $0x30] sm:$0xff] }
  0xf1   :  { %v405_v0 = vmul.f32 0.2, %v257_v55  ;;  %v407_v1 = vmul.f32 0.2, %v370_v56  ;;  %v260_v3 = vpop.f32.mrb[12].mxu0  ;;  %v373_v4 = vpop.f32.mrb[12].mxu1 }
  0xf2   :  { %v436_v5 = vmax.f32 %v255_v51, %v404_v60  ;;  %v438_v6 = vmax.f32 %v368_v52, %v406_v61  ;;  %v261_v7 = vadd.f32 %v260_v3, %v113_v57  ;;  %v374_v8 = vadd.f32 %v373_v4, %v113_v57  ;;  %v262_v9 = vpop.f32.mrb[13].mxu0  ;;  %v375_v10 = vpop.f32.mrb[13].mxu1  ;;  %v451_v51 = vld [vmem:[%s2187_s3 + $0x18] sm:$0xff]  ;;  %v452_v52 = vld [vmem:[%s2187_s3 + $0x20] sm:$0xff]  ;;  %v461_v61 = vld [vmem:[%s2187_s3 + $0x68] sm:$0xff] }
  0xf3   :  { %v437_v11 = vmax.f32 %v257_v55, %v405_v0  ;;  %v439_v12 = vmax.f32 %v370_v56, %v407_v1  ;;  %v263_v13 = vadd.f32 %v262_v9, %v113_v57  ;;  %v376_v14 = vadd.f32 %v375_v10, %v113_v57  ;;  %v455_v55 = vld [vmem:[%s2187_s3 + $0x38] sm:$0xff]  ;;  %v456_v56 = vld [vmem:[%s2187_s3 + $0x40] sm:$0xff]  ;;  %v457_v57 = vld [vmem:[%s2187_s3 + $0x48] sm:$0xff] }
  0xf4   :  { %v1485_v16 = vpack.c.bf16 %v436_v5, %v432_v58  ;;  %v1501_v17 = vpack.c.bf16 %v438_v6, %v434_v59  ;;  %v408_v22 = vmul.f32 0.2, %v261_v7  ;;  %v410_v23 = vmul.f32 0.2, %v374_v8  ;;  %v458_v58 = vld [vmem:[%s2187_s3 + $0x50] sm:$0xff]  ;;  %v459_v59 = vld [vmem:[%s2187_s3 + $0x58] sm:$0xff] }
  0xf5   :  { %v266_v18 = vpop.f32.mrb[14].mxu0  ;;  %v379_v19 = vpop.f32.mrb[14].mxu1  ;;  %v1483_v20 = vpack.c.bf16 %v437_v11, %v433_v62  ;;  %v1499_v21 = vpack.c.bf16 %v439_v12, %v435_v63  ;;  %v409_v28 = vmul.f32 0.2, %v263_v13  ;;  %v411_v29 = vmul.f32 0.2, %v376_v14 }
  0xf6   :  { %v267_v24 = vadd.f32 %v266_v18, %v118_v15  ;;  %v380_v25 = vadd.f32 %v379_v19, %v118_v15  ;;  %v268_v26 = vpop.f32.mrb[15].mxu0  ;;  %v381_v27 = vpop.f32.mrb[15].mxu1  ;;  %v440_v36 = vmax.f32 %v261_v7, %v408_v22  ;;  %v442_v37 = vmax.f32 %v374_v8, %v410_v23  ;;  %v460_v60 = vld [vmem:[%s2187_s3 + $0x60] sm:$0xff]  ;;  %v462_v62 = vld [vmem:[%s2187_s3 + $0x70] sm:$0xff]  ;;  %v463_v63 = vld [vmem:[%s2187_s3 + $0x78] sm:$0xff] }
  0xf7   :  { %v269_v30 = vadd.f32 %v268_v26, %v118_v15  ;;  %v382_v31 = vadd.f32 %v381_v27, %v118_v15  ;;  %1484 = vmatprep.subr.bf16.mxu0 %v1483_v20  ;;  %1500 = vmatprep.subr.bf16.mxu1 %v1499_v21  ;;  %v441_v40 = vmax.f32 %v263_v13, %v409_v28 }
  0xf8   :  { %v412_v32 = vmul.f32 0.2, %v267_v24  ;;  %v414_v33 = vmul.f32 0.2, %v380_v25  ;;  %1486 = vmatpush1.bf16.msra.mxu0 %v1485_v16  ;;  %1502 = vmatpush1.bf16.msra.mxu1 %v1501_v17  ;;  %v443_v41 = vmax.f32 %v376_v14, %v411_v29 }
  0xf9   :  { %v413_v34 = vmul.f32 0.2, %v269_v30  ;;  %v415_v35 = vmul.f32 0.2, %v382_v31 }
  0xfa   :  { %v444_v38 = vmax.f32 %v267_v24, %v412_v32  ;;  %v446_v39 = vmax.f32 %v380_v25, %v414_v33 }
  0xfb   :  { %v445_v42 = vmax.f32 %v269_v30, %v413_v34  ;;  %v447_v43 = vmax.f32 %v382_v31, %v415_v35 }
  0xfc   :  { %v1489_v44 = vpack.c.bf16 %v444_v38, %v440_v36  ;;  %v1505_v45 = vpack.c.bf16 %v446_v39, %v442_v37 }
  0xfd   :  { %v1487_v46 = vpack.c.bf16 %v445_v42, %v441_v40  ;;  %v1503_v47 = vpack.c.bf16 %v447_v43, %v443_v41 }
  0xff   :  { %1488 = vmatprep.subr.bf16.mxu0 %v1487_v46  ;;  %1504 = vmatprep.subr.bf16.mxu1 %v1503_v47 }
 0x100   :  { %1490 = vmatpush1.bf16.msra.mxu0 %v1489_v44  ;;  %1506 = vmatpush1.bf16.msra.mxu1 %v1505_v45 }
 0x103   :  { %1443 = vmatmul.mubr.msk.f32.vlgmr.msra.gmra.mrb[16].mxu0 %vm464_vm2, %v448_v48  ;;  %1459 = vmatmul.mubr.msk.f32.vlgmr.msra.gmra.mrb[16].mxu1 %vm464_vm2, %v448_v48 }
 0x104   :  { %583 = vmatprep.mubr.f32.mxu0 %v1545_v2  ;;  %744 = vmatprep.mubr.f32.mxu1 %v1545_v2 }
 0x107   :  { %1444 = vmatmul.mubr.msk.f32.gmra.mrb[18].mxu0 %vm464_vm2, %v449_v49  ;;  %1460 = vmatmul.mubr.msk.f32.gmra.mrb[18].mxu1 %vm464_vm2, %v449_v49 }
 0x108   :  { %589 = vmatprep.mubr.f32.mxu0 %v1545_v2  ;;  %750 = vmatprep.mubr.f32.mxu1 %v1545_v2 }
 0x10b   :  { %1445 = vmatmul.mubr.msk.f32.gmra.mrb[20].mxu0 %vm464_vm2, %v450_v50  ;;  %1461 = vmatmul.mubr.msk.f32.gmra.mrb[20].mxu1 %vm464_vm2, %v450_v50 }
 0x10c   :  { %595 = vmatprep.mubr.f32.mxu0 %v1545_v2  ;;  %756 = vmatprep.mubr.f32.mxu1 %v1545_v2 }
 0x10f   :  { %1446 = vmatmul.mubr.msk.f32.gmra.mrb[22].mxu0 %vm464_vm2, %v451_v51  ;;  %1462 = vmatmul.mubr.msk.f32.gmra.mrb[22].mxu1 %vm464_vm2, %v451_v51 }
 0x110   :  { %601 = vmatprep.mubr.f32.mxu0 %v1545_v2  ;;  %762 = vmatprep.mubr.f32.mxu1 %v1545_v2 }
 0x113   :  { %1447 = vmatmul.mubr.msk.f32.gmra.mrb[24].mxu0 %vm464_vm2, %v452_v52  ;;  %1463 = vmatmul.mubr.msk.f32.gmra.mrb[24].mxu1 %vm464_vm2, %v452_v52 }
 0x114   :  { %607 = vmatprep.mubr.f32.mxu0 %v1545_v2  ;;  %768 = vmatprep.mubr.f32.mxu1 %v1545_v2 }
 0x117   :  { %1448 = vmatmul.mubr.msk.f32.gmra.mrb[26].mxu0 %vm464_vm2, %v453_v53  ;;  %1464 = vmatmul.mubr.msk.f32.gmra.mrb[26].mxu1 %vm464_vm2, %v453_v53 }
 0x118   :  { %613 = vmatprep.mubr.f32.mxu0 %v1545_v2  ;;  %774 = vmatprep.mubr.f32.mxu1 %v1545_v2 }
 0x11b   :  { %1449 = vmatmul.mubr.msk.f32.gmra.mrb[28].mxu0 %vm464_vm2, %v454_v54  ;;  %1465 = vmatmul.mubr.msk.f32.gmra.mrb[28].mxu1 %vm464_vm2, %v454_v54 }
 0x11c   :  { %619 = vmatprep.mubr.f32.mxu0 %v1545_v2  ;;  %780 = vmatprep.mubr.f32.mxu1 %v1545_v2 }
 0x11f   :  { %1450 = vmatmul.mubr.msk.f32.gmra.mrb[30].mxu0 %vm464_vm2, %v455_v55  ;;  %1466 = vmatmul.mubr.msk.f32.gmra.mrb[30].mxu1 %vm464_vm2, %v455_v55 }
 0x120   :  { %625 = vmatprep.mubr.f32.mxu0 %v1545_v2  ;;  %786 = vmatprep.mubr.f32.mxu1 %v1545_v2 }
 0x123   :  { %1451 = vmatmul.mubr.msk.f32.gmra.mrb[32].mxu0 %vm464_vm2, %v456_v56  ;;  %1467 = vmatmul.mubr.msk.f32.gmra.mrb[32].mxu1 %vm464_vm2, %v456_v56 }
 0x124   :  { %631 = vmatprep.mubr.f32.mxu0 %v1545_v2  ;;  %792 = vmatprep.mubr.f32.mxu1 %v1545_v2 }
 0x127   :  { %1452 = vmatmul.mubr.msk.f32.gmra.mrb[34].mxu0 %vm464_vm2, %v457_v57  ;;  %1468 = vmatmul.mubr.msk.f32.gmra.mrb[34].mxu1 %vm464_vm2, %v457_v57 }
 0x128   :  { %637 = vmatprep.mubr.f32.mxu0 %v1545_v2  ;;  %798 = vmatprep.mubr.f32.mxu1 %v1545_v2 }
 0x12b   :  { %1453 = vmatmul.mubr.msk.f32.gmra.mrb[36].mxu0 %vm464_vm2, %v458_v58  ;;  %1469 = vmatmul.mubr.msk.f32.gmra.mrb[36].mxu1 %vm464_vm2, %v458_v58 }
 0x12c   :  { %643 = vmatprep.mubr.f32.mxu0 %v1545_v2  ;;  %804 = vmatprep.mubr.f32.mxu1 %v1545_v2 }
 0x12f   :  { %1454 = vmatmul.mubr.msk.f32.gmra.mrb[38].mxu0 %vm464_vm2, %v459_v59  ;;  %1470 = vmatmul.mubr.msk.f32.gmra.mrb[38].mxu1 %vm464_vm2, %v459_v59 }
 0x130   :  { %649 = vmatprep.mubr.f32.mxu0 %v1545_v2  ;;  %810 = vmatprep.mubr.f32.mxu1 %v1545_v2 }
 0x133   :  { %1455 = vmatmul.mubr.msk.f32.gmra.mrb[40].mxu0 %vm464_vm2, %v460_v60  ;;  %1471 = vmatmul.mubr.msk.f32.gmra.mrb[40].mxu1 %vm464_vm2, %v460_v60 }
 0x134   :  { %655 = vmatprep.mubr.f32.mxu0 %v1545_v2  ;;  %816 = vmatprep.mubr.f32.mxu1 %v1545_v2 }
 0x137   :  { %1456 = vmatmul.mubr.msk.f32.gmra.mrb[42].mxu0 %vm464_vm2, %v461_v61  ;;  %1472 = vmatmul.mubr.msk.f32.gmra.mrb[42].mxu1 %vm464_vm2, %v461_v61 }
 0x138   :  { %661 = vmatprep.mubr.f32.mxu0 %v1545_v2  ;;  %822 = vmatprep.mubr.f32.mxu1 %v1545_v2 }
 0x13b   :  { %1457 = vmatmul.mubr.msk.f32.gmra.mrb[44].mxu0 %vm464_vm2, %v462_v62  ;;  %1473 = vmatmul.mubr.msk.f32.gmra.mrb[44].mxu1 %vm464_vm2, %v462_v62 }
 0x13c   :  { %667 = vmatprep.mubr.f32.mxu0 %v1545_v2  ;;  %828 = vmatprep.mubr.f32.mxu1 %v1545_v2 }
 0x13f   :  { %1458 = vmatmul.mubr.msk.f32.gmra.mrb[46].mxu0 %vm464_vm2, %v463_v63  ;;  %1474 = vmatmul.mubr.msk.f32.gmra.mrb[46].mxu1 %vm464_vm2, %v463_v63 }
 0x1d6   :  { %v579_v0 = vpop.f32.mrb[16].mxu0  ;;  %v740_v1 = vpop.f32.mrb[16].mxu1 }
 0x1d7   :  { %v980_v3 = vmul.f32 %v579_v0, %v579_v0  ;;  %v581_v4 = vpop.f32.mrb[17].mxu0  ;;  %v742_v5 = vpop.f32.mrb[17].mxu1  ;;  %v982_v8 = vmul.f32 %v740_v1, %v740_v1 }
 0x1d8   :  { %v851_v6 = vadd.f32 %v581_v4, %v579_v0  ;;  %v981_v7 = vmul.f32 %v581_v4, %v581_v4  ;;  %v983_v2 = vmul.f32 %v742_v5, %v742_v5 }
 0x1da   :  { %v1044_v9 = vadd.f32 %v981_v7, %v980_v3  ;;  %v852_v10 = vadd.f32 %v851_v6, %v740_v1  ;;  %v585_v11 = vpop.f32.mrb[18].mxu0  ;;  %v746_v12 = vpop.f32.mrb[18].mxu1 }
 0x1db   :  { %v984_v13 = vmul.f32 %v585_v11, %v585_v11  ;;  %v587_v14 = vpop.f32.mrb[19].mxu0  ;;  %v748_v15 = vpop.f32.mrb[19].mxu1  ;;  %v986_v18 = vmul.f32 %v746_v12, %v746_v12 }
 0x1dc   :  { %v856_v16 = vadd.f32 %v587_v14, %v585_v11  ;;  %v985_v17 = vmul.f32 %v587_v14, %v587_v14  ;;  %v853_v19 = vadd.f32 %v852_v10, %v742_v5  ;;  %v1045_v20 = vadd.f32 %v1044_v9, %v982_v8 }
 0x1dd   :  { %v987_v25 = vmul.f32 %v748_v15, %v748_v15 }
 0x1de   :  { %v1049_v21 = vadd.f32 %v985_v17, %v984_v13  ;;  %v857_v22 = vadd.f32 %v856_v16, %v746_v12  ;;  %854 = vadd.xlane.f32.xlu0 %v853_v19  ;;  %v591_v23 = vpop.f32.mrb[20].mxu0  ;;  %v752_v24 = vpop.f32.mrb[20].mxu1  ;;  %v1046_v26 = vadd.f32 %v1045_v20, %v983_v2 }
 0x1df   :  { %v988_v27 = vmul.f32 %v591_v23, %v591_v23  ;;  %v593_v28 = vpop.f32.mrb[21].mxu0  ;;  %v754_v29 = vpop.f32.mrb[21].mxu1  ;;  %v990_v34 = vmul.f32 %v752_v24, %v752_v24 }
 0x1e0   :  { %v861_v30 = vadd.f32 %v593_v28, %v591_v23  ;;  %v989_v31 = vmul.f32 %v593_v28, %v593_v28  ;;  %v1050_v32 = vadd.f32 %v1049_v21, %v986_v18  ;;  %v858_v33 = vadd.f32 %v857_v22, %v748_v15  ;;  %1047 = vadd.xlane.f32.xlu1 %v1046_v26 }
 0x1e1   :  { %v991_v42 = vmul.f32 %v754_v29, %v754_v29 }
 0x1e2   :  { %v1054_v35 = vadd.f32 %v989_v31, %v988_v27  ;;  %v862_v36 = vadd.f32 %v861_v30, %v752_v24  ;;  %v1051_v37 = vadd.f32 %v1050_v32, %v987_v25  ;;  %v597_v38 = vpop.f32.mrb[22].mxu0  ;;  %v758_v39 = vpop.f32.mrb[22].mxu1 }
 0x1e3   :  { %v992_v40 = vmul.f32 %v597_v38, %v597_v38  ;;  %v599_v41 = vpop.f32.mrb[23].mxu0  ;;  %v760_v43 = vpop.f32.mrb[23].mxu1  ;;  %v994_v47 = vmul.f32 %v758_v39, %v758_v39 }
 0x1e4   :  { %1052 = vadd.xlane.f32.xlu0 %v1051_v37  ;;  %v866_v44 = vadd.f32 %v599_v41, %v597_v38  ;;  %v993_v45 = vmul.f32 %v599_v41, %v599_v41  ;;  %v863_v46 = vadd.f32 %v862_v36, %v754_v29  ;;  %859 = vadd.xlane.f32.xlu1 %v858_v33 }
 0x1e5   :  { %v1055_v48 = vadd.f32 %v1054_v35, %v990_v34  ;;  %v995_v55 = vmul.f32 %v760_v43, %v760_v43 }
 0x1e6   :  { %v1059_v49 = vadd.f32 %v993_v45, %v992_v40  ;;  %v603_v50 = vpop.f32.mrb[24].mxu0  ;;  %v867_v51 = vadd.f32 %v866_v44, %v758_v39  ;;  %v764_v52 = vpop.f32.mrb[24].mxu1 }
 0x1e7   :  { %v996_v53 = vmul.f32 %v603_v50, %v603_v50  ;;  %v605_v54 = vpop.f32.mrb[25].mxu0  ;;  %v1056_v56 = vadd.f32 %v1055_v48, %v991_v42  ;;  %v766_v57 = vpop.f32.mrb[25].mxu1  ;;  %v998_v61 = vmul.f32 %v764_v52, %v764_v52 }
 0x1e8   :  { %v871_v58 = vadd.f32 %v605_v54, %v603_v50  ;;  %v997_v59 = vmul.f32 %v605_v54, %v605_v54  ;;  %864 = vadd.xlane.f32.xlu0 %v863_v46  ;;  %v868_v60 = vadd.f32 %v867_v51, %v760_v43  ;;  %v1060_v62 = vadd.f32 %v1059_v49, %v994_v47 }
 0x1e9   :  { %1057 = vadd.xlane.f32.xlu1 %v1056_v56  ;;  %v999_v4 = vmul.f32 %v766_v57, %v766_v57 }
 0x1ea   :  { %v1064_v63 = vadd.f32 %v997_v59, %v996_v53  ;;  %v872_v0 = vadd.f32 %v871_v58, %v764_v52  ;;  %v609_v1 = vpop.f32.mrb[26].mxu0  ;;  %v770_v3 = vpop.f32.mrb[26].mxu1  ;;  %v1061_v8 = vadd.f32 %v1060_v62, %v995_v55 }
 0x1eb   :  { %v1000_v5 = vmul.f32 %v609_v1, %v609_v1  ;;  %v611_v6 = vpop.f32.mrb[27].mxu0  ;;  %v772_v7 = vpop.f32.mrb[27].mxu1  ;;  %v1002_v12 = vmul.f32 %v770_v3, %v770_v3 }
 0x1ec   :  { %869 = vadd.xlane.f32.xlu0 %v868_v60  ;;  %v876_v9 = vadd.f32 %v611_v6, %v609_v1  ;;  %v1001_v10 = vmul.f32 %v611_v6, %v611_v6  ;;  %v873_v11 = vadd.f32 %v872_v0, %v766_v57  ;;  %v1065_v13 = vadd.f32 %v1064_v63, %v998_v61 }
 0x1ed   :  { %v1003_v2 = vmul.f32 %v772_v7, %v772_v7 }
 0x1ee   :  { %v1069_v14 = vadd.f32 %v1001_v10, %v1000_v5  ;;  %874 = vadd.xlane.f32.xlu1 %v873_v11  ;;  %v615_v15 = vpop.f32.mrb[28].mxu0  ;;  %v877_v16 = vadd.f32 %v876_v9, %v770_v3  ;;  %v776_v17 = vpop.f32.mrb[28].mxu1  ;;  %v1066_v20 = vadd.f32 %v1065_v13, %v999_v4 }
 0x1ef   :  { %v1004_v18 = vmul.f32 %v615_v15, %v615_v15  ;;  %v617_v19 = vpop.f32.mrb[29].mxu0  ;;  %v778_v21 = vpop.f32.mrb[29].mxu1  ;;  %v1006_v25 = vmul.f32 %v776_v17, %v776_v17 }
 0x1f0   :  { %v881_v22 = vadd.f32 %v617_v19, %v615_v15  ;;  %v1005_v23 = vmul.f32 %v617_v19, %v617_v19  ;;  %1062 = vadd.xlane.f32.xlu0 %v1061_v8  ;;  %v878_v24 = vadd.f32 %v877_v16, %v772_v7  ;;  %v1070_v26 = vadd.f32 %v1069_v14, %v1002_v12 }
 0x1f1   :  { %v1007_v31 = vmul.f32 %v778_v21, %v778_v21 }
 0x1f2   :  { %v1074_v27 = vadd.f32 %v1005_v23, %v1004_v18  ;;  %v882_v28 = vadd.f32 %v881_v22, %v776_v17  ;;  %1067 = vadd.xlane.f32.xlu1 %v1066_v20  ;;  %v621_v29 = vpop.f32.mrb[30].mxu0  ;;  %v782_v30 = vpop.f32.mrb[30].mxu1  ;;  %v1071_v35 = vadd.f32 %v1070_v26, %v1003_v2 }
 0x1f3   :  { %v1008_v32 = vmul.f32 %v621_v29, %v621_v29  ;;  %v623_v33 = vpop.f32.mrb[31].mxu0  ;;  %v784_v34 = vpop.f32.mrb[31].mxu1  ;;  %v1010_v39 = vmul.f32 %v782_v30, %v782_v30 }
 0x1f4   :  { %879 = vadd.xlane.f32.xlu0 %v878_v24  ;;  %v886_v36 = vadd.f32 %v623_v33, %v621_v29  ;;  %v1009_v37 = vmul.f32 %v623_v33, %v623_v33  ;;  %v883_v38 = vadd.f32 %v882_v28, %v778_v21  ;;  %v1075_v40 = vadd.f32 %v1074_v27, %v1006_v25 }
 0x1f5   :  { %v1011_v47 = vmul.f32 %v784_v34, %v784_v34 }
 0x1f6   :  { %v1079_v41 = vadd.f32 %v1009_v37, %v1008_v32  ;;  %884 = vadd.xlane.f32.xlu1 %v883_v38  ;;  %v627_v42 = vpop.f32.mrb[32].mxu0  ;;  %v887_v43 = vadd.f32 %v886_v36, %v782_v30  ;;  %v788_v44 = vpop.f32.mrb[32].mxu1  ;;  %v1076_v48 = vadd.f32 %v1075_v40, %v1007_v31 }
 0x1f7   :  { %v1012_v45 = vmul.f32 %v627_v42, %v627_v42  ;;  %v629_v46 = vpop.f32.mrb[33].mxu0  ;;  %v790_v49 = vpop.f32.mrb[33].mxu1  ;;  %v1014_v53 = vmul.f32 %v788_v44, %v788_v44 }
 0x1f8   :  { %v891_v50 = vadd.f32 %v629_v46, %v627_v42  ;;  %v1013_v51 = vmul.f32 %v629_v46, %v629_v46  ;;  %1072 = vadd.xlane.f32.xlu0 %v1071_v35  ;;  %v888_v52 = vadd.f32 %v887_v43, %v784_v34  ;;  %v1080_v54 = vadd.f32 %v1079_v41, %v1010_v39 }
 0x1f9   :  { %v1015_v59 = vmul.f32 %v790_v49, %v790_v49 }
 0x1fa   :  { %v1084_v55 = vadd.f32 %v1013_v51, %v1012_v45  ;;  %v892_v56 = vadd.f32 %v891_v50, %v788_v44  ;;  %1077 = vadd.xlane.f32.xlu1 %v1076_v48  ;;  %v633_v57 = vpop.f32.mrb[34].mxu0  ;;  %v794_v58 = vpop.f32.mrb[34].mxu1  ;;  %v1081_v63 = vadd.f32 %v1080_v54, %v1011_v47 }
 0x1fb   :  { %v1016_v60 = vmul.f32 %v633_v57, %v633_v57  ;;  %v635_v61 = vpop.f32.mrb[35].mxu0  ;;  %v796_v62 = vpop.f32.mrb[35].mxu1  ;;  %v1018_v4 = vmul.f32 %v794_v58, %v794_v58 }
 0x1fc   :  { %889 = vadd.xlane.f32.xlu0 %v888_v52  ;;  %v896_v0 = vadd.f32 %v635_v61, %v633_v57  ;;  %v1017_v1 = vmul.f32 %v635_v61, %v635_v61  ;;  %v893_v3 = vadd.f32 %v892_v56, %v790_v49  ;;  %v1085_v5 = vadd.f32 %v1084_v55, %v1014_v53 }
 0x1fd   :  { %v1019_v12 = vmul.f32 %v796_v62, %v796_v62 }
 0x1fe   :  { %v1089_v6 = vadd.f32 %v1017_v1, %v1016_v60  ;;  %894 = vadd.xlane.f32.xlu1 %v893_v3  ;;  %v639_v7 = vpop.f32.mrb[36].mxu0  ;;  %v897_v8 = vadd.f32 %v896_v0, %v794_v58  ;;  %v800_v9 = vpop.f32.mrb[36].mxu1  ;;  %v1086_v13 = vadd.f32 %v1085_v5, %v1015_v59 }
 0x1ff   :  { %v1020_v10 = vmul.f32 %v639_v7, %v639_v7  ;;  %v641_v11 = vpop.f32.mrb[37].mxu0  ;;  %v802_v14 = vpop.f32.mrb[37].mxu1  ;;  %v1022_v18 = vmul.f32 %v800_v9, %v800_v9 }
 0x200   :  { %v901_v15 = vadd.f32 %v641_v11, %v639_v7  ;;  %v1021_v16 = vmul.f32 %v641_v11, %v641_v11  ;;  %1082 = vadd.xlane.f32.xlu0 %v1081_v63  ;;  %v898_v17 = vadd.f32 %v897_v8, %v796_v62  ;;  %v1090_v19 = vadd.f32 %v1089_v6, %v1018_v4 }
 0x201   :  { %v1023_v23 = vmul.f32 %v802_v14, %v802_v14 }
 0x202   :  { %v1094_v2 = vadd.f32 %v1021_v16, %v1020_v10  ;;  %v902_v20 = vadd.f32 %v901_v15, %v800_v9  ;;  %1087 = vadd.xlane.f32.xlu1 %v1086_v13  ;;  %v645_v21 = vpop.f32.mrb[38].mxu0  ;;  %v806_v22 = vpop.f32.mrb[38].mxu1  ;;  %v1091_v27 = vadd.f32 %v1090_v19, %v1019_v12 }
 0x203   :  { %v1024_v24 = vmul.f32 %v645_v21, %v645_v21  ;;  %v647_v25 = vpop.f32.mrb[39].mxu0  ;;  %v808_v26 = vpop.f32.mrb[39].mxu1  ;;  %v1026_v31 = vmul.f32 %v806_v22, %v806_v22 }
 0x204   :  { %899 = vadd.xlane.f32.xlu0 %v898_v17  ;;  %v906_v28 = vadd.f32 %v647_v25, %v645_v21  ;;  %v1025_v29 = vmul.f32 %v647_v25, %v647_v25  ;;  %v903_v30 = vadd.f32 %v902_v20, %v802_v14  ;;  %v1095_v32 = vadd.f32 %v1094_v2, %v1022_v18 }
 0x205   :  { %v1027_v39 = vmul.f32 %v808_v26, %v808_v26 }
 0x206   :  { %v1099_v33 = vadd.f32 %v1025_v29, %v1024_v24  ;;  %904 = vadd.xlane.f32.xlu1 %v903_v30  ;;  %v651_v34 = vpop.f32.mrb[40].mxu0  ;;  %v907_v35 = vadd.f32 %v906_v28, %v806_v22  ;;  %v812_v36 = vpop.f32.mrb[40].mxu1  ;;  %v1096_v40 = vadd.f32 %v1095_v32, %v1023_v23  ;;  %v835_v32 = vld [vmem:[#allocation2] sm:$0xff] }
 0x207   :  { %v1028_v37 = vmul.f32 %v651_v34, %v651_v34  ;;  %v653_v38 = vpop.f32.mrb[41].mxu0  ;;  %v814_v41 = vpop.f32.mrb[41].mxu1  ;;  %v1030_v45 = vmul.f32 %v812_v36, %v812_v36 }
 0x208   :  { %v911_v42 = vadd.f32 %v653_v38, %v651_v34  ;;  %v1029_v43 = vmul.f32 %v653_v38, %v653_v38  ;;  %1092 = vadd.xlane.f32.xlu0 %v1091_v27  ;;  %v908_v44 = vadd.f32 %v907_v35, %v808_v26  ;;  %v1100_v46 = vadd.f32 %v1099_v33, %v1026_v31  ;;  %v964_v35 = vld [vmem:[#allocation3] sm:$0xff]  ;;  %v965_v38 = vld [vmem:[#allocation3 + $0x8] sm:$0xff] }
 0x209   :  { %v1031_v51 = vmul.f32 %v814_v41, %v814_v41 }
 0x20a   :  { %v1104_v47 = vadd.f32 %v1029_v43, %v1028_v37  ;;  %v912_v48 = vadd.f32 %v911_v42, %v812_v36  ;;  %1097 = vadd.xlane.f32.xlu1 %v1096_v40  ;;  %v657_v49 = vpop.f32.mrb[42].mxu0  ;;  %v818_v50 = vpop.f32.mrb[42].mxu1  ;;  %v1101_v55 = vadd.f32 %v1100_v46, %v1027_v39  ;;  %v836_v39 = vld [vmem:[#allocation2 + $0x8] sm:$0xff] }
 0x20b   :  { %v1032_v52 = vmul.f32 %v657_v49, %v657_v49  ;;  %v659_v53 = vpop.f32.mrb[43].mxu0  ;;  %v820_v54 = vpop.f32.mrb[43].mxu1  ;;  %v1034_v59 = vmul.f32 %v818_v50, %v818_v50 }
 0x20c   :  { %909 = vadd.xlane.f32.xlu0 %v908_v44  ;;  %v916_v56 = vadd.f32 %v659_v53, %v657_v49  ;;  %v1033_v57 = vmul.f32 %v659_v53, %v659_v53  ;;  %v913_v58 = vadd.f32 %v912_v48, %v814_v41  ;;  %v1105_v60 = vadd.f32 %v1104_v47, %v1030_v45  ;;  %v837_v44 = vld [vmem:[#allocation2 + $0x10] sm:$0xff] }
 0x20d   :  { %v1035_v4 = vmul.f32 %v820_v54, %v820_v54  ;;  %v966_v45 = vld [vmem:[#allocation3 + $0x10] sm:$0xff] }
 0x20e   :  { %v1109_v61 = vadd.f32 %v1033_v57, %v1032_v52  ;;  %914 = vadd.xlane.f32.xlu1 %v913_v58  ;;  %v663_v62 = vpop.f32.mrb[44].mxu0  ;;  %v917_v63 = vadd.f32 %v916_v56, %v818_v50  ;;  %v824_v0 = vpop.f32.mrb[44].mxu1  ;;  %v1106_v5 = vadd.f32 %v1105_v60, %v1031_v51  ;;  %v838_v52 = vld [vmem:[#allocation2 + $0x18] sm:$0xff]  ;;  %v839_v57 = vld [vmem:[#allocation2 + $0x20] sm:$0xff] }
 0x20f   :  { %v1036_v1 = vmul.f32 %v663_v62, %v663_v62  ;;  %v665_v3 = vpop.f32.mrb[45].mxu0  ;;  %v826_v6 = vpop.f32.mrb[45].mxu1  ;;  %v1038_v10 = vmul.f32 %v824_v0, %v824_v0 }
 0x210   :  { %v921_v7 = vadd.f32 %v665_v3, %v663_v62  ;;  %v1037_v8 = vmul.f32 %v665_v3, %v665_v3  ;;  %1102 = vadd.xlane.f32.xlu0 %v1101_v55  ;;  %v918_v9 = vadd.f32 %v917_v63, %v820_v54  ;;  %v1110_v11 = vadd.f32 %v1109_v61, %v1034_v59  ;;  %v967_v61 = vld [vmem:[#allocation3 + $0x18] sm:$0xff] }
 0x211   :  { %v1039_v16 = vmul.f32 %v826_v6, %v826_v6 }
 0x212   :  { %v1114_v12 = vadd.f32 %v1037_v8, %v1036_v1  ;;  %v922_v13 = vadd.f32 %v921_v7, %v824_v0  ;;  %1107 = vadd.xlane.f32.xlu1 %v1106_v5  ;;  %v669_v14 = vpop.f32.mrb[46].mxu0  ;;  %v830_v15 = vpop.f32.mrb[46].mxu1  ;;  %v1111_v19 = vadd.f32 %v1110_v11, %v1035_v4  ;;  %v968_v5 = vld [vmem:[#allocation3 + $0x20] sm:$0xff] }
 0x213   :  { %v1040_v17 = vmul.f32 %v669_v14, %v669_v14  ;;  %v671_v18 = vpop.f32.mrb[47].mxu0  ;;  %v832_v2 = vpop.f32.mrb[47].mxu1  ;;  %v1042_v23 = vmul.f32 %v830_v15, %v830_v15 }
 0x214   :  { %919 = vadd.xlane.f32.xlu0 %v918_v9  ;;  %v926_v20 = vadd.f32 %v671_v18, %v669_v14  ;;  %v1041_v21 = vmul.f32 %v671_v18, %v671_v18  ;;  %v923_v22 = vadd.f32 %v922_v13, %v826_v6  ;;  %v1115_v24 = vadd.f32 %v1114_v12, %v1038_v10  ;;  %v840_v12 = vld [vmem:[#allocation2 + $0x28] sm:$0xff]  ;;  %v841_v18 = vld [vmem:[#allocation2 + $0x30] sm:$0xff] }
 0x215   :  { %v1043_v27 = vmul.f32 %v832_v2, %v832_v2 }
 0x216   :  { %v1119_v25 = vadd.f32 %v1041_v21, %v1040_v17  ;;  %924 = vadd.xlane.f32.xlu1 %v923_v22  ;;  %v927_v26 = vadd.f32 %v926_v20, %v830_v15  ;;  %v1116_v28 = vadd.f32 %v1115_v24, %v1039_v16  ;;  %v969_v24 = vld [vmem:[#allocation3 + $0x28] sm:$0xff] }
 0x218   :  { %1112 = vadd.xlane.f32.xlu0 %v1111_v19  ;;  %v928_v29 = vadd.f32 %v927_v26, %v832_v2  ;;  %v1120_v30 = vadd.f32 %v1119_v25, %v1042_v23 }
 0x21a   :  { %1117 = vadd.xlane.f32.xlu1 %v1116_v28  ;;  %v1121_v31 = vadd.f32 %v1120_v30, %v1043_v27 }
 0x21c   :  { %929 = vadd.xlane.f32.xlu0 %v928_v29 }
 0x220   :  { %1122 = vadd.xlane.f32.xlu0 %v1121_v31  ;;  %v970_v31 = vld [vmem:[#allocation3 + $0x30] sm:$0xff] }
 0x26b   :  { %v855_v33 = vpop.xlane.xlu0 %854 }
 0x26c   :  { %v931_v34 = vadd.f32 %v855_v33, %v835_v32 }
 0x26d   :  { %v1048_v36 = vpop.xlane.xlu1 %1047 }
 0x26e   :  { %948 = vst.msk [vmem:[#allocation2] sm:$0xff] %vm29_vm3, %v931_v34  ;;  %v1124_v37 = vadd.f32 %v1048_v36, %v964_v35 }
 0x270   :  { %1140 = vst.msk [vmem:[#allocation3] sm:$0xff] %vm29_vm3, %v1124_v37  ;;  %v842_v37 = vld [vmem:[#allocation2 + $0x38] sm:$0xff] }
 0x271   :  { %v1053_v40 = vpop.xlane.xlu0 %1052  ;;  %v860_v42 = vpop.xlane.xlu1 %859 }
 0x272   :  { %v1125_v41 = vadd.f32 %v1053_v40, %v965_v38  ;;  %v932_v43 = vadd.f32 %v860_v42, %v836_v39  ;;  %v1271_v42 = vld [vmem:[%s2188_s4] sm:$0xff] }
 0x274   :  { %1141 = vst.msk [vmem:[#allocation3 + $0x8] sm:$0xff] %vm29_vm3, %v1125_v41  ;;  %949 = vst.msk [vmem:[#allocation2 + $0x8] sm:$0xff] %vm29_vm3, %v932_v43 }
 0x275   :  { %v1159_v46 = vld [vmem:[#allocation2] sm:$0xff]  ;;  %v865_v47 = vpop.xlane.xlu0 %864 }
 0x276   :  { %v1857_v48 = vmul.f32 0.001953125, %v1159_v46  ;;  %v933_v49 = vadd.f32 %v865_v47, %v837_v44  ;;  %v1058_v50 = vpop.xlane.xlu1 %1057 }
 0x277   :  { %v1126_v51 = vadd.f32 %v1058_v50, %v966_v45  ;;  %v1191_v54 = vld [vmem:[#allocation3] sm:$0xff] }
 0x278   :  { %v1223_v53 = vmul.f32 %v1857_v48, %v1857_v48  ;;  %950 = vst.msk [vmem:[#allocation2 + $0x10] sm:$0xff] %vm29_vm3, %v933_v49  ;;  %v1207_v55 = vmul.f32 0.001953125, %v1191_v54  ;;  %v843_v50 = vld [vmem:[#allocation2 + $0x40] sm:$0xff] }
 0x279   :  { %1142 = vst.msk [vmem:[#allocation3 + $0x10] sm:$0xff] %vm29_vm3, %v1126_v51  ;;  %v870_v56 = vpop.xlane.xlu0 %869 }
 0x27a   :  { %v934_v58 = vadd.f32 %v870_v56, %v838_v52  ;;  %v1239_v59 = vsub.f32 %v1207_v55, %v1223_v53 }
 0x27b   :  { %v875_v60 = vpop.xlane.xlu1 %874  ;;  %v1192_v62 = vld [vmem:[#allocation3 + $0x8] sm:$0xff] }
 0x27c   :  { %v1160_v63 = vld [vmem:[#allocation2 + $0x8] sm:$0xff]  ;;  %951 = vst.msk [vmem:[#allocation2 + $0x18] sm:$0xff] %vm29_vm3, %v934_v58  ;;  %v935_v0 = vadd.f32 %v875_v60, %v839_v57  ;;  %v1255_v1 = vmax.f32 %v1239_v59, 0.0  ;;  %v1208_v8 = vmul.f32 0.001953125, %v1192_v62  ;;  %v971_v58 = vld [vmem:[#allocation3 + $0x38] sm:$0xff]  ;;  %v1351_v59 = vld [vmem:[%s2189_s5] sm:$0xff] }
 0x27d   :  { %v1864_v3 = vmul.f32 0.001953125, %v1160_v63  ;;  %v1063_v4 = vpop.xlane.xlu0 %1062 }
 0x27e   :  { %952 = vst.msk [vmem:[#allocation2 + $0x20] sm:$0xff] %vm29_vm3, %v935_v0  ;;  %v1127_v6 = vadd.f32 %v1063_v4, %v967_v61  ;;  %v1287_v7 = vadd.f32 1e-05, %v1255_v1  ;;  %v972_v4 = vld [vmem:[#allocation3 + $0x40] sm:$0xff] }
 0x27f   :  { %v1224_v9 = vmul.f32 %v1864_v3, %v1864_v3  ;;  %v1161_v10 = vld [vmem:[#allocation2 + $0x10] sm:$0xff]  ;;  %v1068_v11 = vpop.xlane.xlu1 %1067 }
 0x280   :  { %v1869_v13 = vmul.f32 0.001953125, %v1161_v10  ;;  %v1193_v14 = vld [vmem:[#allocation3 + $0x10] sm:$0xff]  ;;  %1143 = vst.msk [vmem:[#allocation3 + $0x18] sm:$0xff] %vm29_vm3, %v1127_v6  ;;  %v1128_v15 = vadd.f32 %v1068_v11, %v968_v5  ;;  %1513 = vrsqrt.f32 %v1287_v7  ;;  %v1272_v5 = vld [vmem:[%s2188_s4 + $0x8] sm:$0xff] }
 0x281   :  { %v1240_v16 = vsub.f32 %v1208_v8, %v1224_v9  ;;  %v880_v17 = vpop.xlane.xlu0 %879  ;;  %v1209_v2 = vmul.f32 0.001953125, %v1193_v14  ;;  %v844_v14 = vld [vmem:[#allocation2 + $0x48] sm:$0xff] }
 0x282   :  { %v1225_v19 = vmul.f32 %v1869_v13, %v1869_v13  ;;  %1144 = vst.msk [vmem:[#allocation3 + $0x20] sm:$0xff] %vm29_vm3, %v1128_v15  ;;  %v936_v20 = vadd.f32 %v880_v17, %v840_v12 }
 0x283   :  { %v1256_v21 = vmax.f32 %v1240_v16, 0.0  ;;  %v1162_v22 = vld [vmem:[#allocation2 + $0x18] sm:$0xff]  ;;  %v885_v23 = vpop.xlane.xlu1 %884 }
 0x284   :  { %v1241_v25 = vsub.f32 %v1209_v2, %v1225_v19  ;;  %v1875_v26 = vmul.f32 0.001953125, %v1162_v22  ;;  %953 = vst.msk [vmem:[#allocation2 + $0x28] sm:$0xff] %vm29_vm3, %v936_v20  ;;  %v937_v27 = vadd.f32 %v885_v23, %v841_v18  ;;  %v1273_v20 = vld [vmem:[%s2188_s4 + $0x10] sm:$0xff] }
 0x285   :  { %v1288_v28 = vadd.f32 1e-05, %v1256_v21  ;;  %v1163_v29 = vld [vmem:[#allocation2 + $0x20] sm:$0xff]  ;;  %v1073_v30 = vpop.xlane.xlu0 %1072  ;;  %v845_v23 = vld [vmem:[#allocation2 + $0x50] sm:$0xff] }
 0x286   :  { %v1257_v32 = vmax.f32 %v1241_v25, 0.0  ;;  %v1878_v33 = vmul.f32 0.001953125, %v1163_v29  ;;  %954 = vst.msk [vmem:[#allocation2 + $0x30] sm:$0xff] %vm29_vm3, %v937_v27  ;;  %v1129_v34 = vadd.f32 %v1073_v30, %v969_v24  ;;  %v1226_v39 = vmul.f32 %v1875_v26, %v1875_v26  ;;  %v1352_v24 = vld [vmem:[%s2189_s5 + $0x8] sm:$0xff] }
 0x287   :  { %1515 = vrsqrt.f32 %v1288_v28  ;;  %v1194_v35 = vld [vmem:[#allocation3 + $0x18] sm:$0xff]  ;;  %v1078_v36 = vpop.xlane.xlu1 %1077 }
 0x288   :  { %v1289_v38 = vadd.f32 1e-05, %v1257_v32  ;;  %v1210_v40 = vmul.f32 0.001953125, %v1194_v35  ;;  %1145 = vst.msk [vmem:[#allocation3 + $0x28] sm:$0xff] %vm29_vm3, %v1129_v34  ;;  %v1130_v41 = vadd.f32 %v1078_v36, %v970_v31  ;;  %v1227_v43 = vmul.f32 %v1878_v33, %v1878_v33  ;;  %v973_v34 = vld [vmem:[#allocation3 + $0x48] sm:$0xff] }
 0x289   :  { %v1195_v44 = vld [vmem:[#allocation3 + $0x20] sm:$0xff]  ;;  %v890_v45 = vpop.xlane.xlu0 %889 }
 0x28a   :  { %1517 = vrsqrt.f32 %v1289_v38  ;;  %v1242_v46 = vsub.f32 %v1210_v40, %v1226_v39  ;;  %v1211_v47 = vmul.f32 0.001953125, %v1195_v44  ;;  %1146 = vst.msk [vmem:[#allocation3 + $0x30] sm:$0xff] %vm29_vm3, %v1130_v41  ;;  %v938_v49 = vadd.f32 %v890_v45, %v842_v37  ;;  %v1514_v51 = vpop.eup %1513  ;;  %v974_v39 = vld [vmem:[#allocation3 + $0x50] sm:$0xff] }
 0x28b   :  { %v1164_v52 = vld [vmem:[#allocation2 + $0x28] sm:$0xff]  ;;  %v895_v53 = vpop.xlane.xlu1 %894  ;;  %v1319_v54 = vmul.f32 %v1514_v51, %v1271_v42  ;;  %v1353_v41 = vld [vmem:[%s2189_s5 + $0x10] sm:$0xff] }
 0x28c   :  { %v1258_v55 = vmax.f32 %v1242_v46, 0.0  ;;  %v1243_v56 = vsub.f32 %v1211_v47, %v1227_v43  ;;  %v1890_v57 = vmul.f32 0.001953125, %v1164_v52  ;;  %955 = vst.msk [vmem:[#allocation2 + $0x38] sm:$0xff] %vm29_vm3, %v938_v49  ;;  %v939_v61 = vadd.f32 %v895_v53, %v843_v50  ;;  %v846_v49 = vld [vmem:[#allocation2 + $0x58] sm:$0xff] }
 0x28d   :  { %v1165_v60 = vld [vmem:[#allocation2 + $0x30] sm:$0xff]  ;;  %v1083_v62 = vpop.xlane.xlu0 %1082  ;;  %1335 = vst.msk [vmem:[%s2190_s6] sm:$0xff] %vm29_vm3, %v1319_v54  ;;  %v1367_v63 = vmul.f32 %v1319_v54, %v1857_v48  ;;  %v1274_v50 = vld [vmem:[%s2188_s4 + $0x18] sm:$0xff] }
 0x28e   :  { %v1290_v0 = vadd.f32 1e-05, %v1258_v55  ;;  %v1259_v1 = vmax.f32 %v1243_v56, 0.0  ;;  %v1228_v6 = vmul.f32 %v1890_v57, %v1890_v57  ;;  %v1906_v7 = vmul.f32 0.001953125, %v1165_v60  ;;  %956 = vst.msk [vmem:[#allocation2 + $0x40] sm:$0xff] %vm29_vm3, %v939_v61  ;;  %v1275_v60 = vld [vmem:[%s2188_s4 + $0x20] sm:$0xff] }
 0x28f   :  { %v1196_v8 = vld [vmem:[#allocation3 + $0x28] sm:$0xff]  ;;  %v1131_v9 = vadd.f32 %v1083_v62, %v971_v58  ;;  %v1088_v10 = vpop.xlane.xlu1 %1087  ;;  %v1383_v11 = vsub.f32 %v1351_v59, %v1367_v63  ;;  %v847_v58 = vld [vmem:[#allocation2 + $0x60] sm:$0xff] }
 0x290   :  { %1519 = vrsqrt.f32 %v1290_v0  ;;  %v1291_v48 = vadd.f32 1e-05, %v1259_v1  ;;  %v1212_v12 = vmul.f32 0.001953125, %v1196_v8  ;;  %v1229_v16 = vmul.f32 %v1906_v7, %v1906_v7 }
 0x291   :  { %v1516_v15 = vpop.eup %1515  ;;  %v1197_v17 = vld [vmem:[#allocation3 + $0x30] sm:$0xff]  ;;  %1147 = vst.msk [vmem:[#allocation3 + $0x38] sm:$0xff] %vm29_vm3, %v1131_v9  ;;  %v1132_v18 = vadd.f32 %v1088_v10, %v972_v4  ;;  %v900_v19 = vpop.xlane.xlu0 %899  ;;  %1399 = vst.msk [vmem:[%s2191_s7] sm:$0xff] %vm29_vm3, %v1383_v11  ;;  %v1354_v9 = vld [vmem:[%s2189_s5 + $0x18] sm:$0xff] }
 0x292   :  { %v1320_v2 = vmul.f32 %v1516_v15, %v1272_v5  ;;  %1521 = vrsqrt.f32 %v1291_v48  ;;  %v1244_v21 = vsub.f32 %v1212_v12, %v1228_v6  ;;  %v1213_v22 = vmul.f32 0.001953125, %v1197_v17  ;;  %v975_v6 = vld [vmem:[#allocation3 + $0x58] sm:$0xff]  ;;  %v976_v17 = vld [vmem:[#allocation3 + $0x60] sm:$0xff] }
 0x293   :  { %v1166_v25 = vld [vmem:[#allocation2 + $0x38] sm:$0xff]  ;;  %1148 = vst.msk [vmem:[#allocation3 + $0x40] sm:$0xff] %vm29_vm3, %v1132_v18  ;;  %v940_v27 = vadd.f32 %v900_v19, %v844_v14  ;;  %v905_v28 = vpop.xlane.xlu1 %904  ;;  %v1355_v18 = vld [vmem:[%s2189_s5 + $0x20] sm:$0xff] }
 0x294   :  { %v1518_v29 = vpop.eup %1517  ;;  %1336 = vst.msk [vmem:[%s2190_s6 + $0x8] sm:$0xff] %vm29_vm3, %v1320_v2  ;;  %v1368_v30 = vmul.f32 %v1320_v2, %v1864_v3  ;;  %v1260_v31 = vmax.f32 %v1244_v21, 0.0  ;;  %v1245_v32 = vsub.f32 %v1213_v22, %v1229_v16  ;;  %v1928_v36 = vmul.f32 0.001953125, %v1166_v25  ;;  %v848_v25 = vld [vmem:[#allocation2 + $0x68] sm:$0xff] }
 0x295   :  { %v1321_v35 = vmul.f32 %v1518_v29, %v1273_v20  ;;  %957 = vst.msk [vmem:[#allocation2 + $0x48] sm:$0xff] %vm29_vm3, %v940_v27  ;;  %v941_v37 = vadd.f32 %v905_v28, %v845_v23  ;;  %v1093_v38 = vpop.xlane.xlu0 %1092  ;;  %v1167_v44 = vld [vmem:[#allocation2 + $0x40] sm:$0xff]  ;;  %v1276_v27 = vld [vmem:[%s2188_s4 + $0x28] sm:$0xff] }
 0x296   :  { %v1384_v40 = vsub.f32 %v1352_v24, %v1368_v30  ;;  %v1292_v42 = vadd.f32 1e-05, %v1260_v31  ;;  %v1261_v43 = vmax.f32 %v1245_v32, 0.0  ;;  %v1939_v45 = vmul.f32 0.001953125, %v1167_v44 }
 0x297   :  { %1337 = vst.msk [vmem:[%s2190_s6 + $0x10] sm:$0xff] %vm29_vm3, %v1321_v35  ;;  %v1369_v3 = vmul.f32 %v1321_v35, %v1869_v13  ;;  %958 = vst.msk [vmem:[#allocation2 + $0x50] sm:$0xff] %vm29_vm3, %v941_v37  ;;  %v1133_v46 = vadd.f32 %v1093_v38, %v973_v34  ;;  %v1098_v47 = vpop.xlane.xlu1 %1097  ;;  %v1230_v54 = vmul.f32 %v1928_v36, %v1928_v36  ;;  %v849_v38 = vld [vmem:[#allocation2 + $0x70] sm:$0xff] }
 0x298   :  { %1400 = vst.msk [vmem:[%s2191_s7 + $0x8] sm:$0xff] %vm29_vm3, %v1384_v40  ;;  %1523 = vrsqrt.f32 %v1292_v42  ;;  %v1293_v51 = vadd.f32 1e-05, %v1261_v43  ;;  %v1198_v52 = vld [vmem:[#allocation3 + $0x38] sm:$0xff]  ;;  %v1134_v13 = vadd.f32 %v1098_v47, %v974_v39  ;;  %v1231_v0 = vmul.f32 %v1939_v45, %v1939_v45  ;;  %v1277_v40 = vld [vmem:[%s2188_s4 + $0x30] sm:$0xff] }
 0x299   :  { %v1385_v53 = vsub.f32 %v1353_v41, %v1369_v3  ;;  %v1214_v55 = vmul.f32 0.001953125, %v1198_v52  ;;  %1149 = vst.msk [vmem:[#allocation3 + $0x48] sm:$0xff] %vm29_vm3, %v1133_v46  ;;  %v910_v56 = vpop.xlane.xlu0 %909 }
 0x29a   :  { %v1520_v59 = vpop.eup %1519  ;;  %1525 = vrsqrt.f32 %v1293_v51  ;;  %v1199_v61 = vld [vmem:[#allocation3 + $0x40] sm:$0xff]  ;;  %1150 = vst.msk [vmem:[#allocation3 + $0x50] sm:$0xff] %vm29_vm3, %v1134_v13  ;;  %v942_v62 = vadd.f32 %v910_v56, %v846_v49  ;;  %v977_v49 = vld [vmem:[#allocation3 + $0x68] sm:$0xff] }
 0x29b   :  { %1401 = vst.msk [vmem:[%s2191_s7 + $0x10] sm:$0xff] %vm29_vm3, %v1385_v53  ;;  %v1322_v63 = vmul.f32 %v1520_v59, %v1274_v50  ;;  %v1246_v1 = vsub.f32 %v1214_v55, %v1230_v54  ;;  %v1215_v4 = vmul.f32 0.001953125, %v1199_v61  ;;  %v915_v5 = vpop.xlane.xlu1 %914  ;;  %v1356_v51 = vld [vmem:[%s2189_s5 + $0x28] sm:$0xff]  ;;  %v1357_v61 = vld [vmem:[%s2189_s5 + $0x30] sm:$0xff] }
 0x29c   :  { %v1522_v8 = vpop.eup %1521  ;;  %v1168_v10 = vld [vmem:[#allocation2 + $0x48] sm:$0xff]  ;;  %959 = vst.msk [vmem:[#allocation2 + $0x58] sm:$0xff] %vm29_vm3, %v942_v62  ;;  %v943_v11 = vadd.f32 %v915_v5, %v847_v58 }
 0x29d   :  { %1338 = vst.msk [vmem:[%s2190_s6 + $0x18] sm:$0xff] %vm29_vm3, %v1322_v63  ;;  %v1370_v48 = vmul.f32 %v1322_v63, %v1875_v26  ;;  %v1323_v12 = vmul.f32 %v1522_v8, %v1275_v60  ;;  %v1262_v14 = vmax.f32 %v1246_v1, 0.0  ;;  %v1247_v15 = vsub.f32 %v1215_v4, %v1231_v0  ;;  %v1103_v16 = vpop.xlane.xlu0 %1102  ;;  %v978_v60 = vld [vmem:[#allocation3 + $0x70] sm:$0xff]  ;;  %v850_v8 = vld [vmem:[#allocation2 + $0x78] sm:$0xff] }
 0x29e   :  { %v1974_v19 = vmul.f32 0.001953125, %v1168_v10  ;;  %v1169_v2 = vld [vmem:[#allocation2 + $0x50] sm:$0xff]  ;;  %960 = vst.msk [vmem:[#allocation2 + $0x60] sm:$0xff] %vm29_vm3, %v943_v11  ;;  %v1135_v20 = vadd.f32 %v1103_v16, %v975_v6 }
 0x29f   :  { %v1386_v21 = vsub.f32 %v1354_v9, %v1370_v48  ;;  %1339 = vst.msk [vmem:[%s2190_s6 + $0x20] sm:$0xff] %vm29_vm3, %v1323_v12  ;;  %v1371_v26 = vmul.f32 %v1323_v12, %v1878_v33  ;;  %v1294_v22 = vadd.f32 1e-05, %v1262_v14  ;;  %v1263_v23 = vmax.f32 %v1247_v15, 0.0  ;;  %v1108_v24 = vpop.xlane.xlu1 %1107 }
 0x2a0   :  { %v1232_v28 = vmul.f32 %v1974_v19, %v1974_v19  ;;  %v1987_v29 = vmul.f32 0.001953125, %v1169_v2  ;;  %v1200_v30 = vld [vmem:[#allocation3 + $0x48] sm:$0xff]  ;;  %1151 = vst.msk [vmem:[#allocation3 + $0x58] sm:$0xff] %vm29_vm3, %v1135_v20  ;;  %v1136_v31 = vadd.f32 %v1108_v24, %v976_v17 }
 0x2a1   :  { %1402 = vst.msk [vmem:[%s2191_s7 + $0x18] sm:$0xff] %vm29_vm3, %v1386_v21  ;;  %v1387_v33 = vsub.f32 %v1355_v18, %v1371_v26  ;;  %1527 = vrsqrt.f32 %v1294_v22  ;;  %v1295_v32 = vadd.f32 1e-05, %v1263_v23  ;;  %v1216_v34 = vmul.f32 0.001953125, %v1200_v30  ;;  %v1201_v35 = vld [vmem:[#allocation3 + $0x50] sm:$0xff]  ;;  %v920_v37 = vpop.xlane.xlu0 %919  ;;  %v1279_v21 = vld [vmem:[%s2188_s4 + $0x40] sm:$0xff] }
 0x2a2   :  { %v1524_v39 = vpop.eup %1523  ;;  %v1233_v41 = vmul.f32 %v1987_v29, %v1987_v29  ;;  %v1217_v42 = vmul.f32 0.001953125, %v1201_v35  ;;  %1152 = vst.msk [vmem:[#allocation3 + $0x60] sm:$0xff] %vm29_vm3, %v1136_v31  ;;  %v944_v43 = vadd.f32 %v920_v37, %v848_v25  ;;  %v979_v25 = vld [vmem:[#allocation3 + $0x78] sm:$0xff] }
 0x2a3   :  { %1403 = vst.msk [vmem:[%s2191_s7 + $0x20] sm:$0xff] %vm29_vm3, %v1387_v33  ;;  %v1324_v44 = vmul.f32 %v1524_v39, %v1276_v27  ;;  %1529 = vrsqrt.f32 %v1295_v32  ;;  %v1248_v3 = vsub.f32 %v1216_v34, %v1232_v28  ;;  %v1170_v46 = vld [vmem:[#allocation2 + $0x58] sm:$0xff]  ;;  %v925_v47 = vpop.xlane.xlu1 %924 }
 0x2a4   :  { %v1526_v50 = vpop.eup %1525  ;;  %v1249_v52 = vsub.f32 %v1217_v42, %v1233_v41  ;;  %v2007_v13 = vmul.f32 0.001953125, %v1170_v46  ;;  %961 = vst.msk [vmem:[#allocation2 + $0x68] sm:$0xff] %vm29_vm3, %v944_v43  ;;  %v945_v53 = vadd.f32 %v925_v47, %v849_v38  ;;  %v1358_v28 = vld [vmem:[%s2189_s5 + $0x38] sm:$0xff]  ;;  %v1359_v38 = vld [vmem:[%s2189_s5 + $0x40] sm:$0xff] }
 0x2a5   :  { %1340 = vst.msk [vmem:[%s2190_s6 + $0x28] sm:$0xff] %vm29_vm3, %v1324_v44  ;;  %v1372_v54 = vmul.f32 %v1324_v44, %v1890_v57  ;;  %v1325_v55 = vmul.f32 %v1526_v50, %v1277_v40  ;;  %v1264_v56 = vmax.f32 %v1248_v3, 0.0  ;;  %v1171_v58 = vld [vmem:[#allocation2 + $0x60] sm:$0xff]  ;;  %v1113_v59 = vpop.xlane.xlu0 %1112  ;;  %v1280_v44 = vld [vmem:[%s2188_s4 + $0x48] sm:$0xff] }
 0x2a6   :  { %v1265_v62 = vmax.f32 %v1249_v52, 0.0  ;;  %v2018_v63 = vmul.f32 0.001953125, %v1171_v58  ;;  %962 = vst.msk [vmem:[#allocation2 + $0x70] sm:$0xff] %vm29_vm3, %v945_v53  ;;  %v1137_v0 = vadd.f32 %v1113_v59, %v977_v49  ;;  %v1234_v10 = vmul.f32 %v2007_v13, %v2007_v13  ;;  %v1360_v59 = vld [vmem:[%s2189_s5 + $0x48] sm:$0xff] }
 0x2a7   :  { %v1388_v1 = vsub.f32 %v1356_v51, %v1372_v54  ;;  %1341 = vst.msk [vmem:[%s2190_s6 + $0x30] sm:$0xff] %vm29_vm3, %v1325_v55  ;;  %v1373_v57 = vmul.f32 %v1325_v55, %v1906_v7  ;;  %v1296_v4 = vadd.f32 1e-05, %v1264_v56  ;;  %v1202_v5 = vld [vmem:[#allocation3 + $0x58] sm:$0xff]  ;;  %v1118_v6 = vpop.xlane.xlu1 %1117 }
 0x2a8   :  { %v1297_v9 = vadd.f32 1e-05, %v1265_v62  ;;  %v1218_v11 = vmul.f32 0.001953125, %v1202_v5  ;;  %1153 = vst.msk [vmem:[#allocation3 + $0x68] sm:$0xff] %vm29_vm3, %v1137_v0  ;;  %v1138_v48 = vadd.f32 %v1118_v6, %v978_v60  ;;  %v1278_v7 = vld [vmem:[%s2188_s4 + $0x38] sm:$0xff]  ;;  %v1235_v14 = vmul.f32 %v2018_v63, %v2018_v63 }
 0x2a9   :  { %1404 = vst.msk [vmem:[%s2191_s7 + $0x28] sm:$0xff] %vm29_vm3, %v1388_v1  ;;  %v1389_v12 = vsub.f32 %v1357_v61, %v1373_v57  ;;  %1531 = vrsqrt.f32 %v1296_v4  ;;  %v1203_v15 = vld [vmem:[#allocation3 + $0x60] sm:$0xff]  ;;  %v930_v16 = vpop.xlane.xlu0 %929  ;;  %v1361_v1 = vld [vmem:[%s2189_s5 + $0x50] sm:$0xff] }
 0x2aa   :  { %1533 = vrsqrt.f32 %v1297_v9  ;;  %v1250_v17 = vsub.f32 %v1218_v11, %v1234_v10  ;;  %v1219_v18 = vmul.f32 0.001953125, %v1203_v15  ;;  %1154 = vst.msk [vmem:[#allocation3 + $0x70] sm:$0xff] %vm29_vm3, %v1138_v48  ;;  %v946_v2 = vadd.f32 %v930_v16, %v850_v8  ;;  %v1282_v8 = vld [vmem:[%s2188_s4 + $0x58] sm:$0xff] }
 0x2ab   :  { %v1528_v20 = vpop.eup %1527  ;;  %1405 = vst.msk [vmem:[%s2191_s7 + $0x30] sm:$0xff] %vm29_vm3, %v1389_v12  ;;  %v1172_v26 = vld [vmem:[#allocation2 + $0x68] sm:$0xff]  ;;  %v1362_v16 = vld [vmem:[%s2189_s5 + $0x58] sm:$0xff] }
 0x2ac   :  { %v1326_v22 = vmul.f32 %v1528_v20, %v1278_v7  ;;  %v1266_v23 = vmax.f32 %v1250_v17, 0.0  ;;  %v1251_v24 = vsub.f32 %v1219_v18, %v1235_v14  ;;  %963 = vst.msk [vmem:[#allocation2 + $0x78] sm:$0xff] %vm29_vm3, %v946_v2  ;;  %v2050_v30 = vmul.f32 0.001953125, %v1172_v26  ;;  %v1363_v20 = vld [vmem:[%s2189_s5 + $0x60] sm:$0xff] }
 0x2ad   :  { %v1530_v27 = vpop.eup %1529  ;;  %v1173_v31 = vld [vmem:[#allocation2 + $0x70] sm:$0xff]  ;;  %v1123_v33 = vpop.xlane.xlu0 %1122 }
 0x2ae   :  { %1342 = vst.msk [vmem:[%s2190_s6 + $0x38] sm:$0xff] %vm29_vm3, %v1326_v22  ;;  %v1374_v32 = vmul.f32 %v1326_v22, %v1928_v36  ;;  %v1327_v34 = vmul.f32 %v1530_v27, %v1279_v21  ;;  %v1298_v35 = vadd.f32 1e-05, %v1266_v23  ;;  %v1267_v37 = vmax.f32 %v1251_v24, 0.0  ;;  %v1284_v23 = vld [vmem:[%s2188_s4 + $0x68] sm:$0xff]  ;;  %v1285_v24 = vld [vmem:[%s2188_s4 + $0x70] sm:$0xff] }
 0x2af   :  { %v2060_v39 = vmul.f32 0.001953125, %v1173_v31  ;;  %v1204_v40 = vld [vmem:[#allocation3 + $0x68] sm:$0xff]  ;;  %v1139_v41 = vadd.f32 %v1123_v33, %v979_v25  ;;  %v1236_v3 = vmul.f32 %v2050_v30, %v2050_v30 }
 0x2b0   :  { %v1390_v42 = vsub.f32 %v1358_v28, %v1374_v32  ;;  %1343 = vst.msk [vmem:[%s2190_s6 + $0x40] sm:$0xff] %vm29_vm3, %v1327_v34  ;;  %v1375_v43 = vmul.f32 %v1327_v34, %v1939_v45  ;;  %1535 = vrsqrt.f32 %v1298_v35  ;;  %v1299_v36 = vadd.f32 1e-05, %v1267_v37  ;;  %v1281_v45 = vld [vmem:[%s2188_s4 + $0x50] sm:$0xff]  ;;  %v1364_v28 = vld [vmem:[%s2189_s5 + $0x68] sm:$0xff] }
 0x2b1   :  { %v1220_v46 = vmul.f32 0.001953125, %v1204_v40  ;;  %v1205_v47 = vld [vmem:[#allocation3 + $0x70] sm:$0xff]  ;;  %1155 = vst.msk [vmem:[#allocation3 + $0x78] sm:$0xff] %vm29_vm3, %v1139_v41  ;;  %v1237_v50 = vmul.f32 %v2060_v39, %v2060_v39 }
 0x2b2   :  { %1406 = vst.msk [vmem:[%s2191_s7 + $0x38] sm:$0xff] %vm29_vm3, %v1390_v42  ;;  %v1391_v49 = vsub.f32 %v1359_v38, %v1375_v43  ;;  %1537 = vrsqrt.f32 %v1299_v36  ;;  %v1221_v51 = vmul.f32 0.001953125, %v1205_v47  ;;  %v1365_v32 = vld [vmem:[%s2189_s5 + $0x70] sm:$0xff]  ;;  %v1286_v38 = vld [vmem:[%s2188_s4 + $0x78] sm:$0xff] }
 0x2b3   :  { %v1532_v52 = vpop.eup %1531  ;;  %v1252_v53 = vsub.f32 %v1220_v46, %v1236_v3  ;;  %v1174_v54 = vld [vmem:[#allocation2 + $0x78] sm:$0xff] }
 0x2b4   :  { %v1534_v55 = vpop.eup %1533  ;;  %1407 = vst.msk [vmem:[%s2191_s7 + $0x40] sm:$0xff] %vm29_vm3, %v1391_v49  ;;  %v1328_v56 = vmul.f32 %v1532_v52, %v1280_v44  ;;  %v1253_v58 = vsub.f32 %v1221_v51, %v1237_v50  ;;  %v1190_v62 = vmul.f32 0.001953125, %v1174_v54 }
 0x2b5   :  { %v1329_v60 = vmul.f32 %v1534_v55, %v1281_v45  ;;  %v1268_v61 = vmax.f32 %v1252_v53, 0.0 }
 0x2b6   :  { %1344 = vst.msk [vmem:[%s2190_s6 + $0x48] sm:$0xff] %vm29_vm3, %v1328_v56  ;;  %v1376_v0 = vmul.f32 %v1328_v56, %v1974_v19  ;;  %v1269_v57 = vmax.f32 %v1253_v58, 0.0  ;;  %v1238_v11 = vmul.f32 %v1190_v62, %v1190_v62 }
 0x2b7   :  { %1345 = vst.msk [vmem:[%s2190_s6 + $0x50] sm:$0xff] %vm29_vm3, %v1329_v60  ;;  %v1377_v4 = vmul.f32 %v1329_v60, %v1987_v29  ;;  %v1300_v5 = vadd.f32 1e-05, %v1268_v61  ;;  %v1283_v29 = vld [vmem:[%s2188_s4 + $0x60] sm:$0xff] }
 0x2b8   :  { %v1392_v6 = vsub.f32 %v1360_v59, %v1376_v0  ;;  %v1301_v9 = vadd.f32 1e-05, %v1269_v57  ;;  %v1206_v19 = vld [vmem:[#allocation3 + $0x78] sm:$0xff] }
 0x2b9   :  { %v1393_v10 = vsub.f32 %v1361_v1, %v1377_v4  ;;  %1539 = vrsqrt.f32 %v1300_v5  ;;  %v1222_v48 = vmul.f32 0.001953125, %v1206_v19 }
 0x2ba   :  { %v1536_v12 = vpop.eup %1535  ;;  %1408 = vst.msk [vmem:[%s2191_s7 + $0x48] sm:$0xff] %vm29_vm3, %v1392_v6  ;;  %1541 = vrsqrt.f32 %v1301_v9 }
 0x2bb   :  { %1409 = vst.msk [vmem:[%s2191_s7 + $0x50] sm:$0xff] %vm29_vm3, %v1393_v10  ;;  %v1330_v7 = vmul.f32 %v1536_v12, %v1282_v8  ;;  %v1254_v14 = vsub.f32 %v1222_v48, %v1238_v11 }
 0x2bc   :  { %v1538_v15 = vpop.eup %1537 }
 0x2bd   :  { %1346 = vst.msk [vmem:[%s2190_s6 + $0x58] sm:$0xff] %vm29_vm3, %v1330_v7  ;;  %v1378_v17 = vmul.f32 %v1330_v7, %v2007_v13  ;;  %v1331_v18 = vmul.f32 %v1538_v15, %v1283_v29  ;;  %v1270_v2 = vmax.f32 %v1254_v14, 0.0 }
 0x2bf   :  { %v1394_v21 = vsub.f32 %v1362_v16, %v1378_v17  ;;  %1347 = vst.msk [vmem:[%s2190_s6 + $0x60] sm:$0xff] %vm29_vm3, %v1331_v18  ;;  %v1379_v26 = vmul.f32 %v1331_v18, %v2018_v63  ;;  %v1302_v22 = vadd.f32 1e-05, %v1270_v2 }
 0x2c1   :  { %1410 = vst.msk [vmem:[%s2191_s7 + $0x58] sm:$0xff] %vm29_vm3, %v1394_v21  ;;  %v1395_v13 = vsub.f32 %v1363_v20, %v1379_v26  ;;  %1543 = vrsqrt.f32 %v1302_v22 }
 0x2c3   :  { %v1540_v25 = vpop.eup %1539  ;;  %1411 = vst.msk [vmem:[%s2191_s7 + $0x60] sm:$0xff] %vm29_vm3, %v1395_v13 }
 0x2c4   :  { %v1542_v63 = vpop.eup %1541  ;;  %v1332_v27 = vmul.f32 %v1540_v25, %v1284_v23 }
 0x2c5   :  { %v1333_v31 = vmul.f32 %v1542_v63, %v1285_v24 }
 0x2c6   :  { %1348 = vst.msk [vmem:[%s2190_s6 + $0x68] sm:$0xff] %vm29_vm3, %v1332_v27  ;;  %v1380_v33 = vmul.f32 %v1332_v27, %v2050_v30 }
 0x2c7   :  { %1349 = vst.msk [vmem:[%s2190_s6 + $0x70] sm:$0xff] %vm29_vm3, %v1333_v31  ;;  %v1381_v34 = vmul.f32 %v1333_v31, %v2060_v39  ;;  %v1366_v39 = vld [vmem:[%s2189_s5 + $0x78] sm:$0xff] }
 0x2c8   :  { %v1396_v35 = vsub.f32 %v1364_v28, %v1380_v33 }
 0x2c9   :  { %v1397_v37 = vsub.f32 %v1365_v32, %v1381_v34 }
 0x2ca   :  { %1412 = vst.msk [vmem:[%s2191_s7 + $0x68] sm:$0xff] %vm29_vm3, %v1396_v35 }
 0x2cb   :  { %v1544_v30 = vpop.eup %1543  ;;  %1413 = vst.msk [vmem:[%s2191_s7 + $0x70] sm:$0xff] %vm29_vm3, %v1397_v37 }
 0x2cc   :  { %v1334_v40 = vmul.f32 %v1544_v30, %v1286_v38 }
 0x2ce   :  { %1350 = vst.msk [vmem:[%s2190_s6 + $0x78] sm:$0xff] %vm29_vm3, %v1334_v40  ;;  %v1382_v41 = vmul.f32 %v1334_v40, %v1190_v62 }
 0x2d0   :  { %v1398_v42 = vsub.f32 %v1366_v39, %v1382_v41 }
 0x2d2   :  { %1414 = vst.msk [vmem:[%s2191_s7 + $0x78] sm:$0xff] %vm29_vm3, %v1398_v42 }

</bundles_post_ra>
